<compile_context>
chip_gen: v5e
topology: v5e:2x2
jax: 0.10.0
libtpu: 0.0.40
codegen_flags: <defaults>
</compile_context>

<pallas_src>
import functools
import math

import jax
import jax.numpy as jnp
from jax.experimental import pallas as pl
from jax.experimental.pallas import tpu as pltpu


# Lane-dense toy config (H, 3H, I are multiples of 128).
CFG = dict(vocab=128, hidden=128, heads=2, layers=2, intermediate=512, max_pos=8)
NPAD = 128  # final Linear(H, 2) output padded to 128 lanes, sliced outside


# ----------------------------------------------------------------------------
# Fused encoder kernel: grid = (batch_tile, layer); one step == one layer of
# one batch tile.
# ----------------------------------------------------------------------------
def _encoder_kernel(emb_ref, mask_ref, emb_g_ref, emb_b_ref,
                    wqkv_ref, bqkv_ref, wo_ref, bo_ref,
                    ln1_g_ref, ln1_b_ref,
                    w1_ref, b1_ref, w2_ref, b2_ref,
                    ln2_g_ref, ln2_b_ref,
                    fcw_ref, fcb_ref,
                    out_ref, x_scr,
                    *, B, S, nh, dh, eps):
    l = pl.program_id(1)
    last_l = pl.num_programs(1) - 1
    H = nh * dh
    M = B * S                          # rows in this batch tile
    scale = 1.0 / math.sqrt(dh)

    def layernorm(h, g, b):
        mu = jnp.mean(h, axis=-1, keepdims=True)
        d = h - mu
        var = jnp.mean(d * d, axis=-1, keepdims=True)
        return d * jax.lax.rsqrt(var + eps) * g + b

    # Layer 0: LayerNorm(embeddings) -> resident activation scratch.
    # TODO(synk): emb_ref stays VMEM-resident across all L steps of a tile;
    # fine at toy size, should be aliased/evicted at production B*S.
    @pl.when(l == 0)
    def _():
        x_scr[...] = layernorm(emb_ref[...], emb_g_ref[...],
                               emb_b_ref[...]).astype(x_scr.dtype)

    x = x_scr[...]                                         # (M, H) f32

    # ---- fused Q/K/V projection: bf16 MXU inputs, f32 accumulation ---------
    qkv = jnp.dot(x.astype(jnp.bfloat16), wqkv_ref[0],
                  preferred_element_type=jnp.float32) + bqkv_ref[0]
    q = qkv[:, :H] * scale                                 # pre-scale q once
    k = qkv[:, H:2 * H]
    v = qkv[:, 2 * H:]

    # K transposed ONCE per layer -> MXU-friendly score matmuls (no implicit
    # per-head transpose inside the loop).
    kT = jnp.swapaxes(k.reshape(B, S, H), 1, 2)            # (B, H, S)

    # Hoisted mask broadcast (JAX does not CSE broadcast_in_dim).
    mask_b = jnp.broadcast_to(mask_ref[...], (B, S, S))    # additive mask

    wo_l = wo_ref[0]                                       # (H, H) bf16

    # ---- multi-head attention; output projection accumulated per head ------
    # (avoids the lane-axis concatenate of per-head contexts entirely)
    attn = jnp.zeros((M, H), jnp.float32)
    for h in range(nh):                                    # static unroll (nh=2)
        qh = q[:, h * dh:(h + 1) * dh].reshape(B, S, dh)
        kTh = kT[:, h * dh:(h + 1) * dh, :]                # (B, dh, S)
        vh = v[:, h * dh:(h + 1) * dh].reshape(B, S, dh)
        s = jnp.einsum("bqd,bdk->bqk", qh, kTh,
                       preferred_element_type=jnp.float32)
        s = s + mask_b
        s = s - jnp.max(s, axis=-1, keepdims=True)
        p = jnp.exp(s)
        p = p * pl.reciprocal(jnp.sum(p, axis=-1, keepdims=True), approx=True)
        ch = jnp.einsum("bqk,bkd->bqd", p, vh,
                        preferred_element_type=jnp.float32)
        attn = attn + jnp.dot(ch.reshape(M, dh).astype(jnp.bfloat16),
                              wo_l[h * dh:(h + 1) * dh, :],
                              preferred_element_type=jnp.float32)

    attn = attn + bo_ref[0]
    x = layernorm(attn + x, ln1_g_ref[0], ln1_b_ref[0])

    # ---- feed-forward (bf16 weights, f32 accumulation) ----------------------
    h1 = jnp.dot(x.astype(jnp.bfloat16), w1_ref[0],
                 preferred_element_type=jnp.float32) + b1_ref[0]
    # TODO(synk): HF BERT uses erf-based GELU; tanh approximation used here.
    h1 = jax.nn.gelu(h1, approximate=True)
    h2 = jnp.dot(h1.astype(jnp.bfloat16), w2_ref[0],
                 preferred_element_type=jnp.float32) + b2_ref[0]
    x = layernorm(h2 + x, ln2_g_ref[0], ln2_b_ref[0])

    # Activation writeback is dead work on the last layer -> skip it.
    @pl.when(l < last_l)
    def _():
        x_scr[...] = x.astype(x_scr.dtype)

    # ---- last layer: [CLS] token -> Linear(H, 2), lane-padded to NPAD -------
    @pl.when(l == last_l)
    def _():
        cls = x.reshape(B, S, H)[:, 0, :]                  # (B, H)
        logits = jnp.dot(cls.astype(jnp.bfloat16), fcw_ref[...],
                         preferred_element_type=jnp.float32) + fcb_ref[...]
        out_ref[...] = logits.reshape(out_ref.shape).astype(out_ref.dtype)


# ----------------------------------------------------------------------------
# Params: per-layer weights stacked along the layer axis; matmul weights bf16.
# ----------------------------------------------------------------------------
def init_params(key, cfg):
    H, I, L = cfg["hidden"], cfg["intermediate"], cfg["layers"]
    std = 0.02
    keys = iter(jax.random.split(key, 16))

    def nrm(shape):
        return (std * jax.random.normal(next(keys), shape)).astype(jnp.float32)

    return dict(
        word_emb=nrm((cfg["vocab"], H)),
        pos_emb=nrm((cfg["max_pos"], H)),
        type_emb=nrm((2, H)),
        emb_ln_g=jnp.ones((1, H), jnp.float32),
        emb_ln_b=jnp.zeros((1, H), jnp.float32),
        # Stacked per-layer matmul weights in bf16 (halve weight DMA bytes).
        wqkv=nrm((L, H, 3 * H)).astype(jnp.bfloat16),
        bqkv=jnp.zeros((L, 1, 3 * H), jnp.float32),
        wo=nrm((L, H, H)).astype(jnp.bfloat16),
        bo=jnp.zeros((L, 1, H), jnp.float32),
        ln1_g=jnp.ones((L, 1, H), jnp.float32),
        ln1_b=jnp.zeros((L, 1, H), jnp.float32),
        w1=nrm((L, H, I)).astype(jnp.bfloat16),
        b1=jnp.zeros((L, 1, I), jnp.float32),
        w2=nrm((L, I, H)).astype(jnp.bfloat16),
        b2=jnp.zeros((L, 1, H), jnp.float32),
        ln2_g=jnp.ones((L, 1, H), jnp.float32),
        ln2_b=jnp.zeros((L, 1, H), jnp.float32),
        fc_w=nrm((H, 2)).astype(jnp.bfloat16),
        fc_b=jnp.zeros((2,), jnp.float32),
    )


# ----------------------------------------------------------------------------
# Forward: embeddings (JAX glue) -> one fused Pallas call -> slice logits.
# ----------------------------------------------------------------------------
def bert_for_as_forward(params, input_ids, attention_mask, cfg):
    B, S = input_ids.shape
    H, nh, L, I = cfg["hidden"], cfg["heads"], cfg["layers"], cfg["intermediate"]
    dh = H // nh

    # Batch tiles: leading "parallel" grid axis (2nd TensorCore on v7x).
    n_bt = 2 if (B % 2 == 0 and ((B // 2) * S) % 8 == 0) else 1
    B_t = B // n_bt
    M_t = B_t * S

    # Embedding gathers are glue; everything downstream runs in the kernel.
    # TODO(synk): token_type_ids hard-coded to all-zeros; dropout absent (eval).
    emb = (params["word_emb"][input_ids]
           + params["pos_emb"][jnp.arange(S)][None, :, :]
           + params["type_emb"][0][None, None, :])
    emb = emb.reshape(B * S, H).astype(jnp.float32)

    # Additive attention mask: 0 where attended, -1e9 where masked.
    mask_add = ((1.0 - attention_mask.astype(jnp.float32)) * -1e9).reshape(B, 1, S)

    # Lane-pad the (H, 2) classifier so the only HBM output store is 128-wide.
    fc_w_pad = jnp.zeros((H, NPAD), jnp.bfloat16).at[:, :2].set(params["fc_w"])
    fc_b_pad = jnp.zeros((1, NPAD), jnp.float32).at[0, :2].set(params["fc_b"])

    kernel = functools.partial(_encoder_kernel, B=B_t, S=S, nh=nh, dh=dh, eps=1e-12)

    grid_spec = pltpu.PrefetchScalarGridSpec(
        num_scalar_prefetch=0,
        grid=(n_bt, L),
        in_specs=[
            pl.BlockSpec((M_t, H), lambda bt, l: (bt, 0)),            # embeddings
            pl.BlockSpec((B_t, 1, S), lambda bt, l: (bt, 0, 0)),      # additive mask
            pl.BlockSpec((1, H), lambda bt, l: (0, 0)),               # emb LN gamma
            pl.BlockSpec((1, H), lambda bt, l: (0, 0)),               # emb LN beta
            pl.BlockSpec((1, H, 3 * H), lambda bt, l: (l, 0, 0)),     # wqkv (bf16, stacked)
            pl.BlockSpec((1, 1, 3 * H), lambda bt, l: (l, 0, 0)),     # bqkv
            pl.BlockSpec((1, H, H), lambda bt, l: (l, 0, 0)),         # wo (bf16)
            pl.BlockSpec((1, 1, H), lambda bt, l: (l, 0, 0)),         # bo
            pl.BlockSpec((1, 1, H), lambda bt, l: (l, 0, 0)),         # ln1 gamma
            pl.BlockSpec((1, 1, H), lambda bt, l: (l, 0, 0)),         # ln1 beta
            pl.BlockSpec((1, H, I), lambda bt, l: (l, 0, 0)),         # w1 (bf16)
            pl.BlockSpec((1, 1, I), lambda bt, l: (l, 0, 0)),         # b1
            pl.BlockSpec((1, I, H), lambda bt, l: (l, 0, 0)),         # w2 (bf16)
            pl.BlockSpec((1, 1, H), lambda bt, l: (l, 0, 0)),         # b2
            pl.BlockSpec((1, 1, H), lambda bt, l: (l, 0, 0)),         # ln2 gamma
            pl.BlockSpec((1, 1, H), lambda bt, l: (l, 0, 0)),         # ln2 beta
            pl.BlockSpec((H, NPAD), lambda bt, l: (0, 0)),            # fc weight (bf16, padded)
            pl.BlockSpec((1, NPAD), lambda bt, l: (0, 0)),            # fc bias (padded)
        ],
        out_specs=pl.BlockSpec((1, B_t, NPAD), lambda bt, l: (bt, 0, 0)),
        scratch_shapes=[pltpu.VMEM((M_t, H), jnp.float32)],           # resident activations
    )

    logits_pad = pl.pallas_call(
        kernel,
        out_shape=jax.ShapeDtypeStruct((n_bt, B_t, NPAD), jnp.float32),
        grid_spec=grid_spec,
        compiler_params=pltpu.CompilerParams(
            # batch tiles parallel (megacore), layers sequential (activation carry)
            dimension_semantics=("parallel", "arbitrary"),
            # TODO(synk): at real BERT sizes (H>=768) also tile w1/w2 over K/N.
            vmem_limit_bytes=32 * 1024 * 1024),
    )(emb, mask_add, params["emb_ln_g"], params["emb_ln_b"],
      params["wqkv"], params["bqkv"], params["wo"], params["bo"],
      params["ln1_g"], params["ln1_b"],
      params["w1"], params["b1"], params["w2"], params["b2"],
      params["ln2_g"], params["ln2_b"],
      fc_w_pad, fc_b_pad)

    return logits_pad.reshape(B, NPAD)[:, :2]                         # (B, 2)


if __name__ == "__main__":
    key = jax.random.PRNGKey(0)
    pkey, ikey = jax.random.split(key)

    params = init_params(pkey, CFG)

    B, S = 2, 8
    input_ids = jax.random.randint(ikey, (B, S), 0, CFG["vocab"], dtype=jnp.int32)
    attention_mask = jnp.ones((B, S), dtype=jnp.int32).at[1, 6:].set(0)

    logits = bert_for_as_forward(params, input_ids, attention_mask, CFG)
    logits = jax.block_until_ready(logits)
    assert logits.shape == (B, 2) and logits.dtype == jnp.float32
    print("KERNEL_OK")
</pallas_src>

<mosaic_0001>
module attributes {stable_mosaic.version = 11 : i64} {
  func.func @_encoder_kernel(%arg0: i32, %arg1: i32, %arg2: memref<8x128xf32, #tpu.memory_space<vmem>>, %arg3: memref<1x1x8xf32, #tpu.memory_space<vmem>>, %arg4: memref<1x128xf32, #tpu.memory_space<vmem>>, %arg5: memref<1x128xf32, #tpu.memory_space<vmem>>, %arg6: memref<1x128x384xbf16, #tpu.memory_space<vmem>>, %arg7: memref<1x1x384xf32, #tpu.memory_space<vmem>>, %arg8: memref<1x128x128xbf16, #tpu.memory_space<vmem>>, %arg9: memref<1x1x128xf32, #tpu.memory_space<vmem>>, %arg10: memref<1x1x128xf32, #tpu.memory_space<vmem>>, %arg11: memref<1x1x128xf32, #tpu.memory_space<vmem>>, %arg12: memref<1x128x512xbf16, #tpu.memory_space<vmem>>, %arg13: memref<1x1x512xf32, #tpu.memory_space<vmem>>, %arg14: memref<1x512x128xbf16, #tpu.memory_space<vmem>>, %arg15: memref<1x1x128xf32, #tpu.memory_space<vmem>>, %arg16: memref<1x1x128xf32, #tpu.memory_space<vmem>>, %arg17: memref<1x1x128xf32, #tpu.memory_space<vmem>>, %arg18: memref<128x128xbf16, #tpu.memory_space<vmem>>, %arg19: memref<1x128xf32, #tpu.memory_space<vmem>>, %arg20: memref<1x1x128xf32, #tpu.memory_space<vmem>>, %arg21: memref<8x128xf32, #tpu.memory_space<vmem>>) attributes {dimension_semantics = [#tpu.dimension_semantics<parallel>, #tpu.dimension_semantics<arbitrary>], iteration_bounds = array<i64: 2, 2>, scalar_prefetch = 0 : i64, scratch_operands = 1 : i64, tpu.core_type = #tpu.core_type<tc>, window_params = [{transform_indices = @transform_0, window_bounds = array<i64: 8, 128>}, {transform_indices = @transform_1, window_bounds = array<i64: 1, 1, 8>}, {pipeline_mode = #tpu.pipeline_mode<synchronous>, transform_indices = @transform_2, window_bounds = array<i64: 1, 128>}, {pipeline_mode = #tpu.pipeline_mode<synchronous>, transform_indices = @transform_3, window_bounds = array<i64: 1, 128>}, {transform_indices = @transform_4, window_bounds = array<i64: 1, 128, 384>}, {transform_indices = @transform_5, window_bounds = array<i64: 1, 1, 384>}, {transform_indices = @transform_6, window_bounds = array<i64: 1, 128, 128>}, {transform_indices = @transform_7, window_bounds = array<i64: 1, 1, 128>}, {transform_indices = @transform_8, window_bounds = array<i64: 1, 1, 128>}, {transform_indices = @transform_9, window_bounds = array<i64: 1, 1, 128>}, {transform_indices = @transform_10, window_bounds = array<i64: 1, 128, 512>}, {transform_indices = @transform_11, window_bounds = array<i64: 1, 1, 512>}, {transform_indices = @transform_12, window_bounds = array<i64: 1, 512, 128>}, {transform_indices = @transform_13, window_bounds = array<i64: 1, 1, 128>}, {transform_indices = @transform_14, window_bounds = array<i64: 1, 1, 128>}, {transform_indices = @transform_15, window_bounds = array<i64: 1, 1, 128>}, {pipeline_mode = #tpu.pipeline_mode<synchronous>, transform_indices = @transform_16, window_bounds = array<i64: 128, 128>}, {pipeline_mode = #tpu.pipeline_mode<synchronous>, transform_indices = @transform_17, window_bounds = array<i64: 1, 128>}, {transform_indices = @transform_18, window_bounds = array<i64: 1, 1, 128>}]} {
    %c0_i32 = arith.constant 0 : i32
    %0 = arith.cmpi eq, %arg1, %c0_i32 : i32
    %1 = arith.extui %0 : i1 to i32
    %c0_i32_0 = arith.constant 0 : i32
    %2 = arith.cmpi ne, %1, %c0_i32_0 : i32
    scf.if %2 {
      %c0_72 = arith.constant 0 : index
      %c0_73 = arith.constant 0 : index
      %160 = vector.load %arg2[%c0_72, %c0_73] : memref<8x128xf32, #tpu.memory_space<vmem>>, vector<8x128xf32>
      %c0_74 = arith.constant 0 : index
      %c0_75 = arith.constant 0 : index
      %161 = vector.load %arg4[%c0_74, %c0_75] : memref<1x128xf32, #tpu.memory_space<vmem>>, vector<1x128xf32>
      %c0_76 = arith.constant 0 : index
      %c0_77 = arith.constant 0 : index
      %162 = vector.load %arg5[%c0_76, %c0_77] : memref<1x128xf32, #tpu.memory_space<vmem>>, vector<1x128xf32>
      %cst_78 = arith.constant dense<0.000000e+00> : vector<8xf32>
      %163 = vector.multi_reduction <add>, %160, %cst_78 [1] : vector<8x128xf32> to vector<8xf32>
      %164 = vector.shape_cast %163 : vector<8xf32> to vector<8x1xf32>
      %cst_79 = arith.constant 1.280000e+02 : f32
      %165 = vector.broadcast %cst_79 : f32 to vector<8x1xf32>
      %166 = arith.divf %164, %165 : vector<8x1xf32>
      %167 = vector.broadcast %166 : vector<8x1xf32> to vector<8x128xf32>
      %168 = arith.subf %160, %167 : vector<8x128xf32>
      %169 = arith.mulf %168, %168 : vector<8x128xf32>
      %cst_80 = arith.constant dense<0.000000e+00> : vector<8xf32>
      %170 = vector.multi_reduction <add>, %169, %cst_80 [1] : vector<8x128xf32> to vector<8xf32>
      %171 = vector.shape_cast %170 : vector<8xf32> to vector<8x1xf32>
      %cst_81 = arith.constant 1.280000e+02 : f32
      %172 = vector.broadcast %cst_81 : f32 to vector<8x1xf32>
      %173 = arith.divf %171, %172 : vector<8x1xf32>
      %cst_82 = arith.constant 9.99999996E-13 : f32
      %174 = vector.broadcast %cst_82 : f32 to vector<8x1xf32>
      %175 = arith.addf %173, %174 : vector<8x1xf32>
      %176 = math.rsqrt %175 : vector<8x1xf32>
      %177 = vector.broadcast %176 : vector<8x1xf32> to vector<8x128xf32>
      %178 = arith.mulf %168, %177 : vector<8x128xf32>
      %179 = vector.broadcast %161 : vector<1x128xf32> to vector<8x128xf32>
      %180 = arith.mulf %178, %179 : vector<8x128xf32>
      %181 = vector.broadcast %162 : vector<1x128xf32> to vector<8x128xf32>
      %182 = arith.addf %180, %181 : vector<8x128xf32>
      %c0_83 = arith.constant 0 : index
      %c0_84 = arith.constant 0 : index
      %183 = vector.load %arg21[%c0_83, %c0_84] : memref<8x128xf32, #tpu.memory_space<vmem>>, vector<8x128xf32>
      tpu.vector_store %arg21[%c0_83, %c0_84], %182 {strides = array<i32>} : memref<8x128xf32, #tpu.memory_space<vmem>>, vector<8x128xf32>,
    } else {
    }
    %c0 = arith.constant 0 : index
    %c0_1 = arith.constant 0 : index
    %3 = vector.load %arg21[%c0, %c0_1] : memref<8x128xf32, #tpu.memory_space<vmem>>, vector<8x128xf32>
    %4 = arith.truncf %3 : vector<8x128xf32> to vector<8x128xbf16>
    %c0_2 = arith.constant 0 : index
    %c0_3 = arith.constant 0 : index
    %c0_4 = arith.constant 0 : index
    %5 = vector.load %arg6[%c0_2, %c0_3, %c0_4] : memref<1x128x384xbf16, #tpu.memory_space<vmem>>, vector<1x128x384xbf16>
    %6 = vector.shape_cast %5 : vector<1x128x384xbf16> to vector<128x384xbf16>
    %cst = arith.constant dense<0.000000e+00> : vector<8x384xf32>
    %7 = tpu.matmul %4, %6, %cst {dimension_numbers = #tpu.dot_dimension_numbers<[1], [0], [0], [1], [0, 0, 1, 1], [], []>} : vector<8x128xbf16>, vector<128x384xbf16>, vector<8x384xf32> -> vector<8x384xf32>
    %c0_5 = arith.constant 0 : index
    %c0_6 = arith.constant 0 : index
    %c0_7 = arith.constant 0 : index
    %8 = vector.load %arg7[%c0_5, %c0_6, %c0_7] : memref<1x1x384xf32, #tpu.memory_space<vmem>>, vector<1x1x384xf32>
    %9 = vector.shape_cast %8 : vector<1x1x384xf32> to vector<1x384xf32>
    %10 = vector.broadcast %9 : vector<1x384xf32> to vector<8x384xf32>
    %11 = arith.addf %7, %10 : vector<8x384xf32>
    %12 = vector.extract_strided_slice %11 {offsets = [0, 0], sizes = [8, 128], strides = [1, 1]} : vector<8x384xf32> to vector<8x128xf32>
    %cst_8 = arith.constant 1.250000e-01 : f32
    %13 = vector.broadcast %cst_8 : f32 to vector<8x128xf32>
    %14 = arith.mulf %12, %13 : vector<8x128xf32>
    %15 = vector.extract_strided_slice %11 {offsets = [0, 128], sizes = [8, 128], strides = [1, 1]} : vector<8x384xf32> to vector<8x128xf32>
    %16 = vector.extract_strided_slice %11 {offsets = [0, 256], sizes = [8, 128], strides = [1, 1]} : vector<8x384xf32> to vector<8x128xf32>
    %17 = vector.shape_cast %15 : vector<8x128xf32> to vector<1x8x128xf32>
    %18 = tpu.transpose %17, [0, 2, 1] : vector<1x8x128xf32> -> vector<1x128x8xf32>
    %c0_9 = arith.constant 0 : index
    %c0_10 = arith.constant 0 : index
    %c0_11 = arith.constant 0 : index
    %19 = vector.load %arg3[%c0_9, %c0_10, %c0_11] : memref<1x1x8xf32, #tpu.memory_space<vmem>>, vector<1x1x8xf32>
    %20 = vector.shape_cast %19 : vector<1x1x8xf32> to vector<1x1x8xf32>
    %21 = vector.broadcast %20 : vector<1x1x8xf32> to vector<1x8x8xf32>
    %c0_12 = arith.constant 0 : index
    %c0_13 = arith.constant 0 : index
    %c0_14 = arith.constant 0 : index
    %22 = vector.load %arg8[%c0_12, %c0_13, %c0_14] : memref<1x128x128xbf16, #tpu.memory_space<vmem>>, vector<1x128x128xbf16>
    %23 = vector.shape_cast %22 : vector<1x128x128xbf16> to vector<128x128xbf16>
    %cst_15 = arith.constant 0.000000e+00 : f32
    %24 = vector.broadcast %cst_15 : f32 to vector<8x128xf32>
    %25 = vector.extract_strided_slice %14 {offsets = [0, 0], sizes = [8, 64], strides = [1, 1]} : vector<8x128xf32> to vector<8x64xf32>
    %26 = vector.shape_cast %25 : vector<8x64xf32> to vector<1x8x64xf32>
    %27 = vector.extract_strided_slice %18 {offsets = [0, 0, 0], sizes = [1, 64, 8], strides = [1, 1, 1]} : vector<1x128x8xf32> to vector<1x64x8xf32>
    %28 = vector.extract_strided_slice %16 {offsets = [0, 0], sizes = [8, 64], strides = [1, 1]} : vector<8x128xf32> to vector<8x64xf32>
    %29 = vector.shape_cast %28 : vector<8x64xf32> to vector<1x8x64xf32>
    "tpu.trace_start"() <{level = 10 : i32, message = "bqd,bdk->bqk"}> : () -> ()
    %cst_16 = arith.constant dense<0.000000e+00> : vector<1x8x8xf32>
    %30 = tpu.matmul %26, %27, %cst_16 {dimension_numbers = #tpu.dot_dimension_numbers<[2], [1], [1], [2], [0, 0, 0, 1, 1, 2], [0], [0]>} : vector<1x8x64xf32>, vector<1x64x8xf32>, vector<1x8x8xf32> -> vector<1x8x8xf32>
    "tpu.trace_stop"() : () -> ()
    %31 = arith.addf %30, %21 : vector<1x8x8xf32>
    %cst_17 = arith.constant dense<0xFF800000> : vector<1x8xf32>
    %32 = vector.multi_reduction <maximumf>, %31, %cst_17 [2] : vector<1x8x8xf32> to vector<1x8xf32>
    %33 = vector.shape_cast %32 : vector<1x8xf32> to vector<1x8x1xf32>
    %34 = vector.broadcast %33 : vector<1x8x1xf32> to vector<1x8x8xf32>
    %35 = arith.subf %31, %34 : vector<1x8x8xf32>
    %36 = math.exp %35 : vector<1x8x8xf32>
    %cst_18 = arith.constant dense<0.000000e+00> : vector<1x8xf32>
    %37 = vector.multi_reduction <add>, %36, %cst_18 [2] : vector<1x8x8xf32> to vector<1x8xf32>
    %38 = vector.shape_cast %37 : vector<1x8xf32> to vector<1x8x1xf32>
    %39 = tpu.reciprocal %38 {approx = true} : vector<1x8x1xf32> -> vector<1x8x1xf32>
    %40 = vector.broadcast %39 : vector<1x8x1xf32> to vector<1x8x8xf32>
    %41 = arith.mulf %36, %40 : vector<1x8x8xf32>
    "tpu.trace_start"() <{level = 10 : i32, message = "bqk,bkd->bqd"}> : () -> ()
    %cst_19 = arith.constant dense<0.000000e+00> : vector<1x8x64xf32>
    %42 = tpu.matmul %41, %29, %cst_19 {dimension_numbers = #tpu.dot_dimension_numbers<[2], [1], [1], [2], [0, 0, 0, 1, 1, 2], [0], [0]>} : vector<1x8x8xf32>, vector<1x8x64xf32>, vector<1x8x64xf32> -> vector<1x8x64xf32>
    "tpu.trace_stop"() : () -> ()
    %43 = vector.shape_cast %42 : vector<1x8x64xf32> to vector<8x64xf32>
    %44 = arith.truncf %43 : vector<8x64xf32> to vector<8x64xbf16>
    %45 = vector.extract_strided_slice %23 {offsets = [0, 0], sizes = [64, 128], strides = [1, 1]} : vector<128x128xbf16> to vector<64x128xbf16>
    %cst_20 = arith.constant dense<0.000000e+00> : vector<8x128xf32>
    %46 = tpu.matmul %44, %45, %cst_20 {dimension_numbers = #tpu.dot_dimension_numbers<[1], [0], [0], [1], [0, 0, 1, 1], [], []>} : vector<8x64xbf16>, vector<64x128xbf16>, vector<8x128xf32> -> vector<8x128xf32>
    %47 = arith.addf %24, %46 : vector<8x128xf32>
    %48 = vector.extract_strided_slice %14 {offsets = [0, 64], sizes = [8, 64], strides = [1, 1]} : vector<8x128xf32> to vector<8x64xf32>
    %49 = vector.shape_cast %48 : vector<8x64xf32> to vector<1x8x64xf32>
    %50 = vector.extract_strided_slice %18 {offsets = [0, 64, 0], sizes = [1, 64, 8], strides = [1, 1, 1]} : vector<1x128x8xf32> to vector<1x64x8xf32>
    %51 = vector.extract_strided_slice %16 {offsets = [0, 64], sizes = [8, 64], strides = [1, 1]} : vector<8x128xf32> to vector<8x64xf32>
    %52 = vector.shape_cast %51 : vector<8x64xf32> to vector<1x8x64xf32>
    "tpu.trace_start"() <{level = 10 : i32, message = "bqd,bdk->bqk"}> : () -> ()
    %cst_21 = arith.constant dense<0.000000e+00> : vector<1x8x8xf32>
    %53 = tpu.matmul %49, %50, %cst_21 {dimension_numbers = #tpu.dot_dimension_numbers<[2], [1], [1], [2], [0, 0, 0, 1, 1, 2], [0], [0]>} : vector<1x8x64xf32>, vector<1x64x8xf32>, vector<1x8x8xf32> -> vector<1x8x8xf32>
    "tpu.trace_stop"() : () -> ()
    %54 = arith.addf %53, %21 : vector<1x8x8xf32>
    %cst_22 = arith.constant dense<0xFF800000> : vector<1x8xf32>
    %55 = vector.multi_reduction <maximumf>, %54, %cst_22 [2] : vector<1x8x8xf32> to vector<1x8xf32>
    %56 = vector.shape_cast %55 : vector<1x8xf32> to vector<1x8x1xf32>
    %57 = vector.broadcast %56 : vector<1x8x1xf32> to vector<1x8x8xf32>
    %58 = arith.subf %54, %57 : vector<1x8x8xf32>
    %59 = math.exp %58 : vector<1x8x8xf32>
    %cst_23 = arith.constant dense<0.000000e+00> : vector<1x8xf32>
    %60 = vector.multi_reduction <add>, %59, %cst_23 [2] : vector<1x8x8xf32> to vector<1x8xf32>
    %61 = vector.shape_cast %60 : vector<1x8xf32> to vector<1x8x1xf32>
    %62 = tpu.reciprocal %61 {approx = true} : vector<1x8x1xf32> -> vector<1x8x1xf32>
    %63 = vector.broadcast %62 : vector<1x8x1xf32> to vector<1x8x8xf32>
    %64 = arith.mulf %59, %63 : vector<1x8x8xf32>
    "tpu.trace_start"() <{level = 10 : i32, message = "bqk,bkd->bqd"}> : () -> ()
    %cst_24 = arith.constant dense<0.000000e+00> : vector<1x8x64xf32>
    %65 = tpu.matmul %64, %52, %cst_24 {dimension_numbers = #tpu.dot_dimension_numbers<[2], [1], [1], [2], [0, 0, 0, 1, 1, 2], [0], [0]>} : vector<1x8x8xf32>, vector<1x8x64xf32>, vector<1x8x64xf32> -> vector<1x8x64xf32>
    "tpu.trace_stop"() : () -> ()
    %66 = vector.shape_cast %65 : vector<1x8x64xf32> to vector<8x64xf32>
    %67 = arith.truncf %66 : vector<8x64xf32> to vector<8x64xbf16>
    %68 = vector.extract_strided_slice %23 {offsets = [64, 0], sizes = [64, 128], strides = [1, 1]} : vector<128x128xbf16> to vector<64x128xbf16>
    %cst_25 = arith.constant dense<0.000000e+00> : vector<8x128xf32>
    %69 = tpu.matmul %67, %68, %cst_25 {dimension_numbers = #tpu.dot_dimension_numbers<[1], [0], [0], [1], [0, 0, 1, 1], [], []>} : vector<8x64xbf16>, vector<64x128xbf16>, vector<8x128xf32> -> vector<8x128xf32>
    %70 = arith.addf %47, %69 : vector<8x128xf32>
    %c0_26 = arith.constant 0 : index
    %c0_27 = arith.constant 0 : index
    %c0_28 = arith.constant 0 : index
    %71 = vector.load %arg9[%c0_26, %c0_27, %c0_28] : memref<1x1x128xf32, #tpu.memory_space<vmem>>, vector<1x1x128xf32>
    %72 = vector.shape_cast %71 : vector<1x1x128xf32> to vector<1x128xf32>
    %73 = vector.broadcast %72 : vector<1x128xf32> to vector<8x128xf32>
    %74 = arith.addf %70, %73 : vector<8x128xf32>
    %75 = arith.addf %74, %3 : vector<8x128xf32>
    %c0_29 = arith.constant 0 : index
    %c0_30 = arith.constant 0 : index
    %c0_31 = arith.constant 0 : index
    %76 = vector.load %arg10[%c0_29, %c0_30, %c0_31] : memref<1x1x128xf32, #tpu.memory_space<vmem>>, vector<1x1x128xf32>
    %77 = vector.shape_cast %76 : vector<1x1x128xf32> to vector<1x128xf32>
    %c0_32 = arith.constant 0 : index
    %c0_33 = arith.constant 0 : index
    %c0_34 = arith.constant 0 : index
    %78 = vector.load %arg11[%c0_32, %c0_33, %c0_34] : memref<1x1x128xf32, #tpu.memory_space<vmem>>, vector<1x1x128xf32>
    %79 = vector.shape_cast %78 : vector<1x1x128xf32> to vector<1x128xf32>
    %cst_35 = arith.constant dense<0.000000e+00> : vector<8xf32>
    %80 = vector.multi_reduction <add>, %75, %cst_35 [1] : vector<8x128xf32> to vector<8xf32>
    %81 = vector.shape_cast %80 : vector<8xf32> to vector<8x1xf32>
    %cst_36 = arith.constant 1.280000e+02 : f32
    %82 = vector.broadcast %cst_36 : f32 to vector<8x1xf32>
    %83 = arith.divf %81, %82 : vector<8x1xf32>
    %84 = vector.broadcast %83 : vector<8x1xf32> to vector<8x128xf32>
    %85 = arith.subf %75, %84 : vector<8x128xf32>
    %86 = arith.mulf %85, %85 : vector<8x128xf32>
    %cst_37 = arith.constant dense<0.000000e+00> : vector<8xf32>
    %87 = vector.multi_reduction <add>, %86, %cst_37 [1] : vector<8x128xf32> to vector<8xf32>
    %88 = vector.shape_cast %87 : vector<8xf32> to vector<8x1xf32>
    %cst_38 = arith.constant 1.280000e+02 : f32
    %89 = vector.broadcast %cst_38 : f32 to vector<8x1xf32>
    %90 = arith.divf %88, %89 : vector<8x1xf32>
    %cst_39 = arith.constant 9.99999996E-13 : f32
    %91 = vector.broadcast %cst_39 : f32 to vector<8x1xf32>
    %92 = arith.addf %90, %91 : vector<8x1xf32>
    %93 = math.rsqrt %92 : vector<8x1xf32>
    %94 = vector.broadcast %93 : vector<8x1xf32> to vector<8x128xf32>
    %95 = arith.mulf %85, %94 : vector<8x128xf32>
    %96 = vector.broadcast %77 : vector<1x128xf32> to vector<8x128xf32>
    %97 = arith.mulf %95, %96 : vector<8x128xf32>
    %98 = vector.broadcast %79 : vector<1x128xf32> to vector<8x128xf32>
    %99 = arith.addf %97, %98 : vector<8x128xf32>
    %100 = arith.truncf %99 : vector<8x128xf32> to vector<8x128xbf16>
    %c0_40 = arith.constant 0 : index
    %c0_41 = arith.constant 0 : index
    %c0_42 = arith.constant 0 : index
    %101 = vector.load %arg12[%c0_40, %c0_41, %c0_42] : memref<1x128x512xbf16, #tpu.memory_space<vmem>>, vector<1x128x512xbf16>
    %102 = vector.shape_cast %101 : vector<1x128x512xbf16> to vector<128x512xbf16>
    %cst_43 = arith.constant dense<0.000000e+00> : vector<8x512xf32>
    %103 = tpu.matmul %100, %102, %cst_43 {dimension_numbers = #tpu.dot_dimension_numbers<[1], [0], [0], [1], [0, 0, 1, 1], [], []>} : vector<8x128xbf16>, vector<128x512xbf16>, vector<8x512xf32> -> vector<8x512xf32>
    %c0_44 = arith.constant 0 : index
    %c0_45 = arith.constant 0 : index
    %c0_46 = arith.constant 0 : index
    %104 = vector.load %arg13[%c0_44, %c0_45, %c0_46] : memref<1x1x512xf32, #tpu.memory_space<vmem>>, vector<1x1x512xf32>
    %105 = vector.shape_cast %104 : vector<1x1x512xf32> to vector<1x512xf32>
    %106 = vector.broadcast %105 : vector<1x512xf32> to vector<8x512xf32>
    %107 = arith.addf %103, %106 : vector<8x512xf32>
    %108 = arith.mulf %107, %107 : vector<8x512xf32>
    %109 = arith.mulf %107, %108 : vector<8x512xf32>
    %cst_47 = arith.constant 4.471500e-02 : f32
    %110 = vector.broadcast %cst_47 : f32 to vector<8x512xf32>
    %111 = arith.mulf %110, %109 : vector<8x512xf32>
    %112 = arith.addf %107, %111 : vector<8x512xf32>
    %cst_48 = arith.constant 0.797884583 : f32
    %113 = vector.broadcast %cst_48 : f32 to vector<8x512xf32>
    %114 = arith.mulf %113, %112 : vector<8x512xf32>
    %115 = math.tanh %114 : vector<8x512xf32>
    %cst_49 = arith.constant 1.000000e+00 : f32
    %116 = vector.broadcast %cst_49 : f32 to vector<8x512xf32>
    %117 = arith.addf %116, %115 : vector<8x512xf32>
    %cst_50 = arith.constant 5.000000e-01 : f32
    %118 = vector.broadcast %cst_50 : f32 to vector<8x512xf32>
    %119 = arith.mulf %118, %117 : vector<8x512xf32>
    %120 = arith.mulf %107, %119 : vector<8x512xf32>
    %121 = arith.truncf %120 : vector<8x512xf32> to vector<8x512xbf16>
    %c0_51 = arith.constant 0 : index
    %c0_52 = arith.constant 0 : index
    %c0_53 = arith.constant 0 : index
    %122 = vector.load %arg14[%c0_51, %c0_52, %c0_53] : memref<1x512x128xbf16, #tpu.memory_space<vmem>>, vector<1x512x128xbf16>
    %123 = vector.shape_cast %122 : vector<1x512x128xbf16> to vector<512x128xbf16>
    %cst_54 = arith.constant dense<0.000000e+00> : vector<8x128xf32>
    %124 = tpu.matmul %121, %123, %cst_54 {dimension_numbers = #tpu.dot_dimension_numbers<[1], [0], [0], [1], [0, 0, 1, 1], [], []>} : vector<8x512xbf16>, vector<512x128xbf16>, vector<8x128xf32> -> vector<8x128xf32>
    %c0_55 = arith.constant 0 : index
    %c0_56 = arith.constant 0 : index
    %c0_57 = arith.constant 0 : index
    %125 = vector.load %arg15[%c0_55, %c0_56, %c0_57] : memref<1x1x128xf32, #tpu.memory_space<vmem>>, vector<1x1x128xf32>
    %126 = vector.shape_cast %125 : vector<1x1x128xf32> to vector<1x128xf32>
    %127 = vector.broadcast %126 : vector<1x128xf32> to vector<8x128xf32>
    %128 = arith.addf %124, %127 : vector<8x128xf32>
    %129 = arith.addf %128, %99 : vector<8x128xf32>
    %c0_58 = arith.constant 0 : index
    %c0_59 = arith.constant 0 : index
    %c0_60 = arith.constant 0 : index
    %130 = vector.load %arg16[%c0_58, %c0_59, %c0_60] : memref<1x1x128xf32, #tpu.memory_space<vmem>>, vector<1x1x128xf32>
    %131 = vector.shape_cast %130 : vector<1x1x128xf32> to vector<1x128xf32>
    %c0_61 = arith.constant 0 : index
    %c0_62 = arith.constant 0 : index
    %c0_63 = arith.constant 0 : index
    %132 = vector.load %arg17[%c0_61, %c0_62, %c0_63] : memref<1x1x128xf32, #tpu.memory_space<vmem>>, vector<1x1x128xf32>
    %133 = vector.shape_cast %132 : vector<1x1x128xf32> to vector<1x128xf32>
    %cst_64 = arith.constant dense<0.000000e+00> : vector<8xf32>
    %134 = vector.multi_reduction <add>, %129, %cst_64 [1] : vector<8x128xf32> to vector<8xf32>
    %135 = vector.shape_cast %134 : vector<8xf32> to vector<8x1xf32>
    %cst_65 = arith.constant 1.280000e+02 : f32
    %136 = vector.broadcast %cst_65 : f32 to vector<8x1xf32>
    %137 = arith.divf %135, %136 : vector<8x1xf32>
    %138 = vector.broadcast %137 : vector<8x1xf32> to vector<8x128xf32>
    %139 = arith.subf %129, %138 : vector<8x128xf32>
    %140 = arith.mulf %139, %139 : vector<8x128xf32>
    %cst_66 = arith.constant dense<0.000000e+00> : vector<8xf32>
    %141 = vector.multi_reduction <add>, %140, %cst_66 [1] : vector<8x128xf32> to vector<8xf32>
    %142 = vector.shape_cast %141 : vector<8xf32> to vector<8x1xf32>
    %cst_67 = arith.constant 1.280000e+02 : f32
    %143 = vector.broadcast %cst_67 : f32 to vector<8x1xf32>
    %144 = arith.divf %142, %143 : vector<8x1xf32>
    %cst_68 = arith.constant 9.99999996E-13 : f32
    %145 = vector.broadcast %cst_68 : f32 to vector<8x1xf32>
    %146 = arith.addf %144, %145 : vector<8x1xf32>
    %147 = math.rsqrt %146 : vector<8x1xf32>
    %148 = vector.broadcast %147 : vector<8x1xf32> to vector<8x128xf32>
    %149 = arith.mulf %139, %148 : vector<8x128xf32>
    %150 = vector.broadcast %131 : vector<1x128xf32> to vector<8x128xf32>
    %151 = arith.mulf %149, %150 : vector<8x128xf32>
    %152 = vector.broadcast %133 : vector<1x128xf32> to vector<8x128xf32>
    %153 = arith.addf %151, %152 : vector<8x128xf32>
    %c1_i32 = arith.constant 1 : i32
    %154 = arith.cmpi slt, %arg1, %c1_i32 : i32
    %155 = arith.extui %154 : i1 to i32
    %c0_i32_69 = arith.constant 0 : i32
    %156 = arith.cmpi ne, %155, %c0_i32_69 : i32
    scf.if %156 {
      %c0_72 = arith.constant 0 : index
      %c0_73 = arith.constant 0 : index
      %160 = vector.load %arg21[%c0_72, %c0_73] : memref<8x128xf32, #tpu.memory_space<vmem>>, vector<8x128xf32>
      tpu.vector_store %arg21[%c0_72, %c0_73], %153 {strides = array<i32>} : memref<8x128xf32, #tpu.memory_space<vmem>>, vector<8x128xf32>,
    } else {
    }
    %c1_i32_70 = arith.constant 1 : i32
    %157 = arith.cmpi eq, %arg1, %c1_i32_70 : i32
    %158 = arith.extui %157 : i1 to i32
    %c0_i32_71 = arith.constant 0 : i32
    %159 = arith.cmpi ne, %158, %c0_i32_71 : i32
    scf.if %159 {
      %160 = vector.shape_cast %153 : vector<8x128xf32> to vector<1x8x128xf32>
      %161 = vector.extract_strided_slice %160 {offsets = [0, 0, 0], sizes = [1, 1, 128], strides = [1, 1, 1]} : vector<1x8x128xf32> to vector<1x1x128xf32>
      %162 = vector.shape_cast %161 : vector<1x1x128xf32> to vector<1x128xf32>
      %163 = arith.truncf %162 : vector<1x128xf32> to vector<1x128xbf16>
      %c0_72 = arith.constant 0 : index
      %c0_73 = arith.constant 0 : index
      %164 = vector.load %arg18[%c0_72, %c0_73] : memref<128x128xbf16, #tpu.memory_space<vmem>>, vector<128x128xbf16>
      %cst_74 = arith.constant dense<0.000000e+00> : vector<1x128xf32>
      %165 = tpu.matmul %163, %164, %cst_74 {dimension_numbers = #tpu.dot_dimension_numbers<[1], [0], [0], [1], [0, 0, 1, 1], [], []>} : vector<1x128xbf16>, vector<128x128xbf16>, vector<1x128xf32> -> vector<1x128xf32>
      %c0_75 = arith.constant 0 : index
      %c0_76 = arith.constant 0 : index
      %166 = vector.load %arg19[%c0_75, %c0_76] : memref<1x128xf32, #tpu.memory_space<vmem>>, vector<1x128xf32>
      %167 = arith.addf %165, %166 : vector<1x128xf32>
      %168 = vector.shape_cast %167 : vector<1x128xf32> to vector<1x1x128xf32>
      %c0_77 = arith.constant 0 : index
      %c0_78 = arith.constant 0 : index
      %c0_79 = arith.constant 0 : index
      %169 = vector.load %arg20[%c0_77, %c0_78, %c0_79] : memref<1x1x128xf32, #tpu.memory_space<vmem>>, vector<1x1x128xf32>
      tpu.vector_store %arg20[%c0_77, %c0_78, %c0_79], %168 {strides = array<i32>} : memref<1x1x128xf32, #tpu.memory_space<vmem>>, vector<1x1x128xf32>,
    } else {
    }
    return
  }
  func.func @transform_0(%arg0: i32, %arg1: i32) -> (i32, i32) {
    %c0_i32 = arith.constant 0 : i32
    %c0_i32_0 = arith.constant 0 : i32
    return %arg0, %c0_i32 : i32, i32
  }
  func.func @transform_1(%arg0: i32, %arg1: i32) -> (i32, i32, i32) {
    %c0_i32 = arith.constant 0 : i32
    %c0_i32_0 = arith.constant 0 : i32
    %c0_i32_1 = arith.constant 0 : i32
    return %arg0, %c0_i32, %c0_i32_0 : i32, i32, i32
  }
  func.func @transform_2(%arg0: i32, %arg1: i32) -> (i32, i32) {
    %c0_i32 = arith.constant 0 : i32
    %c0_i32_0 = arith.constant 0 : i32
    %c0_i32_1 = arith.constant 0 : i32
    return %c0_i32, %c0_i32_0 : i32, i32
  }
  func.func @transform_3(%arg0: i32, %arg1: i32) -> (i32, i32) {
    %c0_i32 = arith.constant 0 : i32
    %c0_i32_0 = arith.constant 0 : i32
    %c0_i32_1 = arith.constant 0 : i32
    return %c0_i32, %c0_i32_0 : i32, i32
  }
  func.func @transform_4(%arg0: i32, %arg1: i32) -> (i32, i32, i32) {
    %c0_i32 = arith.constant 0 : i32
    %c0_i32_0 = arith.constant 0 : i32
    %c0_i32_1 = arith.constant 0 : i32
    return %arg1, %c0_i32, %c0_i32_0 : i32, i32, i32
  }
  func.func @transform_5(%arg0: i32, %arg1: i32) -> (i32, i32, i32) {
    %c0_i32 = arith.constant 0 : i32
    %c0_i32_0 = arith.constant 0 : i32
    %c0_i32_1 = arith.constant 0 : i32
    return %arg1, %c0_i32, %c0_i32_0 : i32, i32, i32
  }
  func.func @transform_6(%arg0: i32, %arg1: i32) -> (i32, i32, i32) {
    %c0_i32 = arith.constant 0 : i32
    %c0_i32_0 = arith.constant 0 : i32
    %c0_i32_1 = arith.constant 0 : i32
    return %arg1, %c0_i32, %c0_i32_0 : i32, i32, i32
  }
  func.func @transform_7(%arg0: i32, %arg1: i32) -> (i32, i32, i32) {
    %c0_i32 = arith.constant 0 : i32
    %c0_i32_0 = arith.constant 0 : i32
    %c0_i32_1 = arith.constant 0 : i32
    return %arg1, %c0_i32, %c0_i32_0 : i32, i32, i32
  }
  func.func @transform_8(%arg0: i32, %arg1: i32) -> (i32, i32, i32) {
    %c0_i32 = arith.constant 0 : i32
    %c0_i32_0 = arith.constant 0 : i32
    %c0_i32_1 = arith.constant 0 : i32
    return %arg1, %c0_i32, %c0_i32_0 : i32, i32, i32
  }
  func.func @transform_9(%arg0: i32, %arg1: i32) -> (i32, i32, i32) {
    %c0_i32 = arith.constant 0 : i32
    %c0_i32_0 = arith.constant 0 : i32
    %c0_i32_1 = arith.constant 0 : i32
    return %arg1, %c0_i32, %c0_i32_0 : i32, i32, i32
  }
  func.func @transform_10(%arg0: i32, %arg1: i32) -> (i32, i32, i32) {
    %c0_i32 = arith.constant 0 : i32
    %c0_i32_0 = arith.constant 0 : i32
    %c0_i32_1 = arith.constant 0 : i32
    return %arg1, %c0_i32, %c0_i32_0 : i32, i32, i32
  }
  func.func @transform_11(%arg0: i32, %arg1: i32) -> (i32, i32, i32) {
    %c0_i32 = arith.constant 0 : i32
    %c0_i32_0 = arith.constant 0 : i32
    %c0_i32_1 = arith.constant 0 : i32
    return %arg1, %c0_i32, %c0_i32_0 : i32, i32, i32
  }
  func.func @transform_12(%arg0: i32, %arg1: i32) -> (i32, i32, i32) {
    %c0_i32 = arith.constant 0 : i32
    %c0_i32_0 = arith.constant 0 : i32
    %c0_i32_1 = arith.constant 0 : i32
    return %arg1, %c0_i32, %c0_i32_0 : i32, i32, i32
  }
  func.func @transform_13(%arg0: i32, %arg1: i32) -> (i32, i32, i32) {
    %c0_i32 = arith.constant 0 : i32
    %c0_i32_0 = arith.constant 0 : i32
    %c0_i32_1 = arith.constant 0 : i32
    return %arg1, %c0_i32, %c0_i32_0 : i32, i32, i32
  }
  func.func @transform_14(%arg0: i32, %arg1: i32) -> (i32, i32, i32) {
    %c0_i32 = arith.constant 0 : i32
    %c0_i32_0 = arith.constant 0 : i32
    %c0_i32_1 = arith.constant 0 : i32
    return %arg1, %c0_i32, %c0_i32_0 : i32, i32, i32
  }
  func.func @transform_15(%arg0: i32, %arg1: i32) -> (i32, i32, i32) {
    %c0_i32 = arith.constant 0 : i32
    %c0_i32_0 = arith.constant 0 : i32
    %c0_i32_1 = arith.constant 0 : i32
    return %arg1, %c0_i32, %c0_i32_0 : i32, i32, i32
  }
  func.func @transform_16(%arg0: i32, %arg1: i32) -> (i32, i32) {
    %c0_i32 = arith.constant 0 : i32
    %c0_i32_0 = arith.constant 0 : i32
    %c0_i32_1 = arith.constant 0 : i32
    return %c0_i32, %c0_i32_0 : i32, i32
  }
  func.func @transform_17(%arg0: i32, %arg1: i32) -> (i32, i32) {
    %c0_i32 = arith.constant 0 : i32
    %c0_i32_0 = arith.constant 0 : i32
    %c0_i32_1 = arith.constant 0 : i32
    return %c0_i32, %c0_i32_0 : i32, i32
  }
  func.func @transform_18(%arg0: i32, %arg1: i32) -> (i32, i32, i32) {
    %c0_i32 = arith.constant 0 : i32
    %c0_i32_0 = arith.constant 0 : i32
    %c0_i32_1 = arith.constant 0 : i32
    return %arg0, %c0_i32, %c0_i32_0 : i32, i32, i32
  }
}

</mosaic_0001>

<bundles_post_ra>
// kernel: tpu_custom_call.1
= control target key start
LH: loop header
LB: loop body
LE: loop exit
PB: predicated region body
PF: predicated region fallthrough
CT: control target
= control target key end

     0   :  { %s4734_s0 = inlined_call_operand.hbm [shape: f32[16,128], index: 0, kind: input, shape index: {}]   ;;  %s4735_s1 = inlined_call_operand.hbm [shape: f32[2,1,8], index: 1, kind: input, shape index: {}]   ;;  %s4736_s2 = inlined_call_operand.hbm [shape: f32[1,128], index: 2, kind: input, shape index: {}]   ;;  %s4737_s3 = inlined_call_operand.hbm [shape: f32[1,128], index: 3, kind: input, shape index: {}]   ;;  %s4738_s4 = inlined_call_operand.hbm [shape: bf16[2,128,384], index: 4, kind: input, shape index: {}]   ;;  %s4739_s5 = inlined_call_operand.hbm [shape: f32[2,1,384], index: 5, kind: input, shape index: {}]   ;;  %s4740_s6 = inlined_call_operand.hbm [shape: bf16[2,128,128], index: 6, kind: input, shape index: {}]   ;;  %s4741_s7 = inlined_call_operand.vmem [shape: f32[2,1,128], index: 7, kind: input, shape index: {}]   ;;  %s4742_s8 = inlined_call_operand.hbm [shape: f32[2,1,128], index: 8, kind: input, shape index: {}]   ;;  %s4743_s9 = inlined_call_operand.hbm [shape: f32[2,1,128], index: 9, kind: input, shape index: {}]   ;;  %s4744_s10 = inlined_call_operand.hbm [shape: bf16[2,128,512], index: 10, kind: input, shape index: {}]   ;;  %s4745_s11 = inlined_call_operand.vmem [shape: f32[2,1,512], index: 11, kind: input, shape index: {}]   ;;  %s4746_s12 = inlined_call_operand.hbm [shape: bf16[2,512,128], index: 12, kind: input, shape index: {}]   ;;  %s4747_s13 = inlined_call_operand.vmem [shape: f32[2,1,128], index: 13, kind: input, shape index: {}]   ;;  %s4748_s14 = inlined_call_operand.hbm [shape: f32[2,1,128], index: 14, kind: input, shape index: {}]   ;;  %s4749_s15 = inlined_call_operand.vmem [shape: f32[2,1,128], index: 15, kind: input, shape index: {}]   ;;  %s4750_s16 = inlined_call_operand.hbm [shape: bf16[128,128], index: 16, kind: input, shape index: {}]   ;;  %s4751_s17 = inlined_call_operand.vmem [shape: f32[1,128], index: 17, kind: input, shape index: {}]   ;;  %s4752_s18 = inlined_call_operand.hbm [shape: f32[2,1,128], index: 18, kind: output, shape index: {}]  }
   0x1   :  { %4778 = sst [smem:[#allocation52_spill]] %s4734_s0 }
   0x2   :  { %4779 = sst [smem:[#allocation53_spill]] %s4735_s1 }
   0x3   :  { %4780 = sst [smem:[#allocation54_spill]] %s4736_s2 }
   0x4   :  { %4781 = sst [smem:[#allocation55_spill]] %s4737_s3 }
   0x5   :  { %4782 = sst [smem:[#allocation56_spill]] %s4738_s4 }
   0x6   :  { %4783 = sst [smem:[#allocation57_spill]] %s4739_s5 }
   0x7   :  { %4784 = sst [smem:[#allocation58_spill]] %s4740_s6 }
   0x8   :  { %4785 = sst [smem:[#allocation59_spill]] %s4741_s7 }
   0x9   :  { %4786 = sst [smem:[#allocation60_spill]] %s4742_s8 }
   0xa   :  { %4787 = sst [smem:[#allocation61_spill]] %s4743_s9 }
   0xb   :  { %4788 = sst [smem:[#allocation62_spill]] %s4744_s10 }
   0xc   :  { %4789 = sst [smem:[#allocation63_spill]] %s4745_s11 }
   0xd   :  { %4790 = sst [smem:[#allocation64_spill]] %s4746_s12 }
   0xe   :  { %4791 = sst [smem:[#allocation65_spill]] %s4747_s13 }
   0xf   :  { %4792 = sst [smem:[#allocation66_spill]] %s4748_s14 }
  0x10   :  { %4793 = sst [smem:[#allocation67_spill]] %s4749_s15 }
  0x11   :  { %4794 = sst [smem:[#allocation68_spill]] %s4750_s16 }
  0x12   :  { %4795 = sst [smem:[#allocation69_spill]] %s4751_s17 }
  0x13   :  { %4796 = sst [smem:[#allocation70_spill]] %s4752_s18 }
  0x14   :  { %23 = vsyncpa [#allocation4], 0 }
  0x15   :  { %25 = vsyncpa [#allocation4 + $0x1], 0 }
  0x16   :  { %26 = vsyncpa [#allocation7], 0 }
  0x17   :  { %28 = vsyncpa [#allocation7 + $0x1], 0 }
  0x18   :  { %29 = vsyncpa [#allocation10], 0 }
  0x19   :  { %30 = vsyncpa [#allocation5], 0 }
  0x1a   :  { %32 = vsyncpa [#allocation5 + $0x1], 0  ;;  %s4070_s27 = smov 0   ;;  %s4072_s28 = smov 0  }
  0x1b   :  { %s4074_s29 = smov 0   ;;  %s4076_s30 = smov 0  }
  0x1c   :  { %s4078_s0 = smov 0   ;;  %s4080_s19 = smov 0  }
  0x1d   :  { %s4082_s1 = smov 0   ;;  %s4084_s20 = smov 0  }
  0x1e   :  { %s4086_s21 = smov 0   ;;  %s4088_s22 = smov 0  }
  0x1f   :  { %s4090_s2 = smov 0  }
  0x20 LB: > { %4797 = sst [smem:[#allocation35_spill]] %s3925_s28  ;;  %s4124_s23 = sadd.s32 4294967295, %s3961_s2   ;;  %s3961_s2 = sphi %s4090_s2, %s38_s2   ;;  %s3957_s22 = sphi %s4088_s22, %s4879_s22   ;;  %s3953_s21 = sphi %s4086_s21, %s4883_s21   ;;  %s3949_s20 = sphi %s4084_s20, %s4877_s20   ;;  %s3945_s1 = sphi %s4082_s1, %s4882_s1   ;;  %s3941_s19 = sphi %s4080_s19, %s4876_s19   ;;  %s3937_s0 = sphi %s4078_s0, %s4881_s0   ;;  %s3933_s30 = sphi %s4076_s30, %s4880_s30   ;;  %s3929_s29 = sphi %s4074_s29, %s4874_s29   ;;  %s3925_s28 = sphi %s4072_s28, %s4873_s28   ;;  %s3921_s27 = sphi %s4070_s27, %s4872_s27  }
  0x21   : > { %4798 = sst [smem:[#allocation36_spill]] %s3929_s29  ;;  %p164_p0 = scmp.ne.s32.totalorder %s3925_s28, %s3921_s27 }
  0x22   : > { %4799 = sst [smem:[#allocation37_spill]] %s3933_s30  ;;  %p4761_p1 = scmp.eq.s32.totalorder %s4124_s23, 0 }
  0x23   : > { %4800 = sst [smem:[#allocation38_spill]] %s3941_s19  ;;  %p2611_p2 = scmp.ge.s32.totalorder %s3961_s2, 1 }
  0x24   : > { %4801 = sst [smem:[#allocation39_spill]] %s3945_s1  ;;  %p529_p3 = scmp.lt.s32.totalorder %s3961_s2, 5 }
  0x25   : > { %4802 = sst [smem:[#allocation40_spill]] %s3949_s20  ;;  %p4132_p4 = por %p164_p0, %p4761_p1 }
  0x26   : > { %4803 = sst [smem:[#allocation41_spill]] %s3957_s22  ;;  %p4139_p5 = pnand %p2611_p2, %p529_p3 }
  0x27   : > { %4804 = sst [smem:[#allocation42_spill]] %s4124_s23  ;;  %s3963_s27 = smov [#allocation8]  }
  0x28   : > { %s4805_s24 = scalar_select %p4132_p4, 1, 0 }
  0x29   : > { %s4807_s18 = sld [smem:[#allocation54_spill]]  ;;  %p3213_p6 = pneg %p4139_p5 }
  0x2a   : > { %4806 = sst [smem:[#allocation43_spill]] %s4805_s24  ;;  %s543_s15 = sshll.u32 %s3963_s27, 4  ;;  %s544_s15 = int_to_ptr.vmem [resolvable:$true] %s543_s15 }
  0x2b   : > { %s4808_s17 = scalar_select %p4139_p5, 1, 0 }
  0x2c   : > { %p4147_p7 = pnand %p3213_p6, %p4761_p1  ;;  %s2610_s25 = sadd.s32 4294967294, %s3961_s2  }
  0x2d   : > { %4809 = sst [smem:[#allocation44_spill]] %s4808_s17  ;;  %s47_s26 = sadd.s32 1, %s3953_s21 }
  0x2e   : > { %s50_s13 = sadd.s32 1, %s3957_s22  ;;  %p48_p8 = scmp.ge.s32.totalorder %s47_s26, 2 }
  0x2f   : > { %s541_s20 = sshll.u32 %s4807_s18, 4  ;;  %s57_s27 = sadd.s32 1, %s3941_s19  ;;  %s542_s20 = int_to_ptr.hbm [resolvable:$true] %s541_s20 }
  0x30   : > { %3216 = dma.hbm_to_vmem [thread:$0]  (!%p4147_p7), %s542_s20, 16, %s544_s15, [#allocation7]  }
  0x31   : > { %p4755_p9 = scmp.ne.s32.totalorder %s3941_s19, %s3937_s0  ;;  %p65_p10 = scmp.eq.s32.totalorder %s3961_s2, 0 }
  0x32   : > { %s4885_s26 = smov (%p48_p8, %s47_s26), 0  ;;  %s4887_s13 = smov (!%p48_p8, %s50_s13), %s3957_s22 }
  0x33   : > { %4811 = sst [smem:[#allocation45_spill]] %s4885_s26  ;;  %p4168_p11 = por %p65_p10, %p4755_p9 }
  0x34   : > { %p4762_p12 = scmp.ne.s32.totalorder %s3937_s0, %s3933_s30  ;;  %p52_p13 = scmp.ge.s32.totalorder %s4887_s13, 2 }
  0x35   : > { %s148_s20 = ssub.s32 %s3953_s21, %s4885_s26  ;;  %s151_s7 = sadd.s32 1, %s3929_s29 }
  0x36   : > { %p4181_p0 = por %p4761_p1, %p4762_p12  ;;  %p149_p2 = scmp.eq.s32.totalorder %s148_s20, 0 }
  0x37   : > { %s4889_s13 = smov (%p52_p13, %s4887_s13), 0  ;;  %p158_p3 = scmp.ne.s32.totalorder %s3929_s29, %s3925_s28 }
  0x38   : > { %s4813_s11 = scalar_select %p4181_p0, 1, 0 }
  0x39   : > { %4815 = sst [smem:[#allocation47_spill]] %s4889_s13  ;;  %s54_s1 = ssub.s32 %s3957_s22, %s4889_s13 }
  0x3a   : > { %4814 = sst [smem:[#allocation46_spill]] %s4813_s11  ;;  %p516_p6 = scmp.eq.s32.totalorder %s4124_s23, 3 }
  0x3b   : > { %p55_p8 = scmp.eq.s32.totalorder %s54_s1, 0  ;;  %p4195_p9 = por %p158_p3, %p65_p10 }
  0x3c   : > { %s4200_s24 = scalar_select %p149_p2, %s3929_s29, %s151_s7  }
  0x3d   : > { %s4203_s11 = scalar_select %p55_p8, %s3941_s19, %s57_s27  }
  0x3e   : > { %4817 = sst [smem:[#allocation48_spill]] %s4200_s24  ;;  %p4819_p1 = scmp.ne.s32.totalorder %s3941_s19, %s3937_s0 }
  0x3f   : > { %4818 = sst [smem:[#allocation49_spill]] %s4203_s11  ;;  %p522_p12 = scmp.eq.s32.totalorder %s2610_s25, 3 }
  0x40   : > { %p4208_p13 = por %p516_p6, %p4819_p1  ;;  %p3261_p4 = scmp.lt.s32.totalorder %s3961_s2, 4 }
  0x41   : > { %s583_s1 = sand.u32 1, %s3961_s2   ;;  %p4822_p10 = scmp.ne.s32.totalorder %s3937_s0, %s3933_s30 }
  0x42   : > { %s4820_s20 = scalar_select %p4208_p13, 1, 0 }
  0x43   : > { %p4217_p3 = por %p522_p12, %p4822_p10  ;;  %s585_s13 = sand.u32 1, %s3941_s19  }
  0x44   : > { %4821 = sst [smem:[#allocation50_spill]] %s4820_s20  ;;  %s2617_s27 = sshll.u32 %s3957_s22, 3 }
  0x45   : > { %s4823_s7 = scalar_select %p4217_p3, 1, 0 }
  0x46   : > { %s2616_s11 = sshll.u32 %s585_s13, 3  ;;  %s4825_s23 = sld [smem:[#allocation52_spill]] }
  0x47   : > { %4824 = sst [smem:[#allocation51_spill]] %s4823_s7  ;;  %s587_s20 = scalar_lea.vmem [#allocation3], %s2616_s11 }
  0x48   : > { %s595_s12 = sshll.u32 %s587_s20, 4  ;;  %p3224_p1 = pnand %p3261_p4, %p4168_p11  ;;  %s596_s12 = int_to_ptr.vmem [resolvable:$true] %s595_s12 }
  0x49   : > { %s4231_s25 = sand.u32 1, %s3929_s29   ;;  %p4237_p12 = pnand %p3261_p4, %p4195_p9 }
  0x4a   : > { %s4241_s28 = scalar_lea.sflag [#allocation4], %s583_s1  ;;  %s605_s15 = scalar_lea.vmem [#allocation6], %s585_s13 }
  0x4b   : > { %s612_s20 = sshll.u32 %s605_s15, 4  ;;  %s3173_s26 = smul.u32 192, %s4231_s25  ;;  %s613_s20 = int_to_ptr.vmem [resolvable:$true] %s612_s20 }
  0x4c   : > { %s591_s17 = scalar_lea.hbm %s4825_s23, %s2617_s27  ;;  %s4827_s23 = sld [smem:[#allocation53_spill]] }
  0x4d   : > { %s593_s14 = sshll.u32 %s591_s17, 4  ;;  %s4249_s29 = scalar_lea.sflag [#allocation7], %s583_s1  ;;  %s594_s14 = int_to_ptr.hbm [resolvable:$true] %s593_s14 }
  0x4e   : > { %3226 = dma.hbm_to_vmem [thread:$0]  (!%p3224_p1), %s594_s14, 128, %s596_s12, %s4241_s28  }
  0x4f   : > { %s3174_s7 = smul.u32 192, %s3953_s21  ;;  %s623_s12 = scalar_lea.vmem [#allocation11], %s3173_s26 }
  0x50   : > { %s631_s14 = sshll.u32 %s623_s12, 4  ;;  %s4828_s4 = sld [smem:[#allocation56_spill]]  ;;  %s632_s14 = int_to_ptr.vmem [resolvable:$true] %s631_s14 }
  0x51   : > { %s3965_s1 = smov 12   ;;  %s3176_s15 = smul.u32 3, %s3953_s21 }
  0x52   : > { %s608_s24 = scalar_lea.hbm %s4827_s23, %s3957_s22  ;;  %s3175_s23 = smul.u32 3, %s4231_s25 }
  0x53   : > { %s610_s27 = sshll.u32 %s608_s24, 4  ;;  %s3964_s24 = smov 192   ;;  %s611_s27 = int_to_ptr.hbm [resolvable:$true] %s610_s27 }
  0x54   : > { %3229 = dma.hbm_to_vmem [thread:$0]  (!%p3224_p1), %s611_s27, 16, %s613_s20, %s4249_s29  }
  0x55   : > { %s645_s20 = scalar_lea.vmem [#allocation12], %s3175_s23  ;;  %s4829_s5 = sld [smem:[#allocation57_spill]] }
  0x56   : > { %s628_s13 = scalar_lea.hbm %s4828_s4, %s3174_s7  ;;  %s653_s27 = sshll.u32 %s645_s20, 4  ;;  %s654_s27 = int_to_ptr.vmem [resolvable:$true] %s653_s27 }
  0x57   : > { %s629_s17 = sshll.u32 %s628_s13, 4  ;;  %s2619_s11 = sshll.u32 %s4231_s25, 6  ;;  %s630_s17 = int_to_ptr.hbm [resolvable:$true] %s629_s17 }
  0x58   : > { %3232 = dma.hbm_to_vmem [thread:$0]  (!%p4237_p12), %s630_s17, 3072, %s632_s14, %s4241_s28, %s3964_s24, %s3964_s24, %s3965_s1  }
  0x59   : > { %s3066_s13 = sshll.u32 %s3953_s21, 6  ;;  %s4830_s6 = sld [smem:[#allocation58_spill]] }
  0x5a   : > { %s664_s23 = scalar_lea.vmem [#allocation13], %s2619_s11  ;;  %s3967_s20 = smov 4  }
  0x5b   : > { %s649_s30 = scalar_lea.hbm %s4829_s5, %s3176_s15  ;;  %s672_s24 = sshll.u32 %s664_s23, 4  ;;  %s673_s24 = int_to_ptr.vmem [resolvable:$true] %s672_s24 }
  0x5c   : > { %s651_s7 = sshll.u32 %s649_s30, 4  ;;  %s4775_s15 = smov 64   ;;  %s652_s7 = int_to_ptr.hbm [resolvable:$true] %s651_s7 }
  0x5d   : > { %3235 = dma.hbm_to_vmem [thread:$0]  (!%p4237_p12), %s652_s7, 48, %s654_s27, %s4249_s29  }
  0x5e   : > { %s4831_s8 = sld [smem:[#allocation60_spill]]  ;;  %s691_s12 = scalar_lea.vmem [#allocation14], %s4231_s25 }
  0x5f   : > { %s669_s17 = scalar_lea.hbm %s4830_s6, %s3066_s13  ;;  %s698_s30 = sshll.u32 %s691_s12, 4  ;;  %s699_s30 = int_to_ptr.vmem [resolvable:$true] %s698_s30 }
  0x60   : > { %s670_s1 = sshll.u32 %s669_s17, 4  ;;  %s4832_s3 = sld [smem:[#allocation55_spill]]  ;;  %s671_s1 = int_to_ptr.hbm [resolvable:$true] %s670_s1 }
  0x61   : > { %3238 = dma.hbm_to_vmem [thread:$0]  (!%p4237_p12), %s671_s1, 1024, %s673_s24, %s4241_s28, %s4775_s15, %s4775_s15, %s3967_s20  }
  0x62   : > { %s3968_s17 = smov [#allocation9]   ;;  %s4833_s9 = sld [smem:[#allocation61_spill]] }
  0x63   : > { %s555_s23 = sshll.u32 %s3968_s17, 4  ;;  %s4834_s10 = sld [smem:[#allocation62_spill]]  ;;  %s556_s23 = int_to_ptr.vmem [resolvable:$true] %s555_s23 }
  0x64   : > { %s694_s4 = scalar_lea.hbm %s4831_s8, %s3953_s21  ;;  %s4835_s16 = sld [smem:[#allocation68_spill]] }
  0x65   : > { %s696_s7 = sshll.u32 %s694_s4, 4  ;;  %s708_s4 = scalar_lea.vmem [#allocation15], %s4231_s25  ;;  %s697_s7 = int_to_ptr.hbm [resolvable:$true] %s696_s7 }
  0x66   : > { %s553_s14 = sshll.u32 %s4832_s3, 4  ;;  %s715_s12 = sshll.u32 %s708_s4, 4  ;;  %s554_s14 = int_to_ptr.hbm [resolvable:$true] %s553_s14  ;;  %s716_s12 = int_to_ptr.vmem [resolvable:$true] %s715_s12 }
  0x67   : > { %3241 = dma.hbm_to_vmem [thread:$0]  (!%p4237_p12), %s697_s7, 16, %s699_s30, %s4249_s29  }
  0x68   : > { %s711_s27 = scalar_lea.hbm %s4833_s9, %s3953_s21  ;;  %s2622_s30 = sshll.u32 %s4231_s25, 8 }
  0x69   : > { %3219 = dma.hbm_to_vmem [thread:$0]  (!%p4147_p7), %s554_s14, 16, %s556_s23, [#allocation10]  }
  0x6a   : > { %s713_s26 = sshll.u32 %s711_s27, 4  ;;  %s3067_s7 = sshll.u32 %s3953_s21, 8  ;;  %s714_s26 = int_to_ptr.hbm [resolvable:$true] %s713_s26 }
  0x6b   : > { %3244 = dma.hbm_to_vmem [thread:$0]  (!%p4237_p12), %s714_s26, 16, %s716_s12, %s4241_s28  }
  0x6c   : > { %s731_s17 = scalar_lea.hbm %s4834_s10, %s3067_s7  ;;  %s726_s1 = scalar_lea.vmem [#allocation16], %s2622_s30 }
  0x6d   : > { %s732_s24 = sshll.u32 %s731_s17, 4  ;;  %s734_s15 = sshll.u32 %s726_s1, 4  ;;  %s733_s24 = int_to_ptr.hbm [resolvable:$true] %s732_s24  ;;  %s735_s15 = int_to_ptr.vmem [resolvable:$true] %s734_s15 }
  0x6e   : > { %s3969_s14 = smov 256   ;;  %s3970_s23 = smov 16  }
  0x6f   : > { %3247 = dma.hbm_to_vmem [thread:$0]  (!%p4237_p12), %s733_s24, 4096, %s735_s15, %s4249_s29, %s3969_s14, %s3969_s14, %s3970_s23  }
  0x70   : > { %s564_s4 = sshll.u32 %s4835_s16, 4  ;;  %s3971_s12 = smov [#allocation19]   ;;  %s565_s4 = int_to_ptr.hbm [resolvable:$true] %s564_s4 }
  0x71   : > { %s566_s11 = sshll.u32 %s3971_s12, 4  ;;  %s4836_s13 = smov 64   ;;  %s567_s11 = int_to_ptr.vmem [resolvable:$true] %s566_s11 }
  0x72   : > { %3222 = dma.hbm_to_vmem [thread:$0]  (!%p4147_p7), %s565_s4, 1024, %s567_s11, [#allocation10], %s4836_s13, %s4836_s13, %s3967_s20  }
  0x73   : > { %s4837_s3 = sld [smem:[#allocation64_spill]]  ;;  %s755_s15 = scalar_lea.vmem [#allocation17], %s2622_s30 }
  0x74   : > { %s763_s24 = sshll.u32 %s755_s15, 4  ;;  %s4838_s27 = sld [smem:[#allocation66_spill]]  ;;  %s764_s24 = int_to_ptr.vmem [resolvable:$true] %s763_s24 }
  0x75   : > { %s782_s12 = scalar_lea.vmem [#allocation18], %s4231_s25  ;;  %s4336_s17 = sand.u32 (!%p4139_p5), 1, %s3937_s0  }
  0x76   : > { %s789_s4 = sshll.u32 %s782_s12, 4  ;;  %s790_s4 = int_to_ptr.vmem [resolvable:$true] %s789_s4 }
  0x79   : > { %s760_s5 = scalar_lea.hbm %s4837_s3, %s3067_s7  ;;  %804 = sbr.rel (%p4139_p5) target bundleno = 2711 (0xa97), region = 92 }
  0x7a   : > { %s761_s14 = sshll.u32 %s760_s5, 4  ;;  %s785_s26 = scalar_lea.hbm %s4838_s27, %s3953_s21  ;;  %s762_s14 = int_to_ptr.hbm [resolvable:$true] %s761_s14 }
  0x7b   : > { %3250 = dma.hbm_to_vmem [thread:$0]  (!%p4237_p12), %s762_s14, 4096, %s764_s24, %s4241_s28, %s4836_s13, %s4836_s13, %s3967_s20  }
  0x7c   : > { %s787_s11 = sshll.u32 %s785_s26, 4  ;;  %s4840_s5 = sld [smem:[#allocation42_spill]] (!%p4139_p5)  ;;  %s788_s11 = int_to_ptr.hbm [resolvable:$true] %s787_s11 }
  0x7d   : > { %3253 = dma.hbm_to_vmem [thread:$0]  (!%p4237_p12), %s788_s11, 16, %s790_s4, %s4249_s29  }
  0x7e   : > { %s2629_s28 = sshll.u32 %s4336_s17, 3 }
  0x7f   : > { %s4341_s25 = scalar_lea.vmem [#allocation3], %s2629_s28 }
  0x82   : > { %s806_s7 = sand.u32 1, %s4840_s5  }
  0x83   : > { %s4339_s20 = scalar_lea.sflag [#allocation4], %s806_s7 }
  0x84   : > { %3864 = dma.done.wait (%p4181_p0), %s4339_s20, 128  }
  0x85   : > { %3866 = vsyncadd (%p4181_p0), %s4339_s20, 4294967168  ;;  %s4349_s29 = scalar_lea.sflag [#allocation7], %s806_s7 }
  0x86   : > { %3868 = dma.done.wait (%p4181_p0), %s4349_s29, 16  }
  0x87   : > { %3870 = vsyncadd (%p4181_p0), %s4349_s29, 4294967280  ;;  %p4842_p4 = scmp.eq.s32.totalorder %s4840_s5, 0 }
  0x89   : > { %3872 = dma.done.wait (%p4842_p4), [#allocation7], 16   ;;  %p4843_p5 = pmov %p4842_p4 }
  0x8a   : > { %p4844_p7 = pmov %p4842_p4 }
  0x8b   : > { %3874 = vsyncadd (%p4843_p5), [#allocation7], 4294967280 }
  0x8c   : > { %3876 = dma.done.wait (%p4844_p7), [#allocation10], 16   ;;  %p4845_p9 = pmov %p4842_p4 }
  0x8d   : > { %s4846_s13 = sld [smem:[#allocation35_spill]] }
  0x8e   : > { %3878 = vsyncadd (%p4845_p9), [#allocation10], 4294967280  ;;  %s4847_s1 = sld [smem:[#allocation43_spill]] }
  0x93   : > { %s4367_s15 = sand.u32 1, %s4846_s13  }
  0x94   : > { %s3177_s24 = smul.u32 192, %s4367_s15  ;;  %p4848_p11 = scmp.ne.s32.totalorder %s4847_s1, 0 }
  0x96   : > { %s4370_s14 = scalar_lea.vmem [#allocation11], %s3177_s24 }
  0x97   : > { %3880 = dma.done.wait (%p4848_p11), %s4339_s20, 3072  }
  0x98   : > { %3882 = vsyncadd (%p4848_p11), %s4339_s20, 4294964224  ;;  %s3178_s23 = smul.u32 3, %s4367_s15 }
  0x9a   : > { %s4379_s18 = scalar_lea.vmem [#allocation12], %s3178_s23 }
  0x9b   : > { %3884 = dma.done.wait (%p4848_p11), %s4349_s29, 48  }
  0x9c   : > { %3886 = vsyncadd (%p4848_p11), %s4349_s29, 4294967248  ;;  %s2632_s27 = sshll.u32 %s4367_s15, 6 }
  0x9d   : > { %s4388_s26 = scalar_lea.vmem [#allocation13], %s2632_s27 }
  0x9e   : > { %3888 = dma.done.wait (%p4848_p11), %s4339_s20, 1024  }
  0x9f   : > { %3890 = vsyncadd (%p4848_p11), %s4339_s20, 4294966272 }
  0xa0   : > { %3892 = dma.done.wait (%p4848_p11), %s4349_s29, 16  }
  0xa1   : > { %3894 = vsyncadd (%p4848_p11), %s4349_s29, 4294967280 }
  0xa2   : > { %3896 = dma.done.wait (%p4848_p11), %s4339_s20, 16  }
  0xa3   : > { %3898 = vsyncadd (%p4848_p11), %s4339_s20, 4294967280  ;;  %s2633_s11 = sshll.u32 %s4367_s15, 8 }
  0xa4   : > { %s4411_s3 = scalar_lea.vmem [#allocation16], %s2633_s11 }
  0xa5   : > { %3900 = dma.done.wait (%p4848_p11), %s4349_s29, 4096  }
  0xa6   : > { %3902 = vsyncadd (%p4848_p11), %s4349_s29, 4294963200  ;;  %s4419_s30 = scalar_lea.vmem [#allocation17], %s2633_s11 }
  0xa7   : > { %3904 = dma.done.wait (%p4848_p11), %s4339_s20, 4096  }
  0xa8   : > { %3906 = vsyncadd (%p4848_p11), %s4339_s20, 4294963200 }
  0xa9   : > { %3908 = dma.done.wait (%p4848_p11), %s4349_s29, 16  }
  0xaa   : > { %3910 = vsyncadd (%p4848_p11), %s4349_s29, 4294967280  ;;  %p4849_p0 = pmov %p4842_p4 }
  0xac   : > { %3912 = dma.done.wait (%p4849_p0), [#allocation10], 1024   ;;  %p4850_p2 = pmov %p4849_p0 }
  0xad   : > { %s4851_s28 = sld [smem:[#allocation39_spill]]  ;;  %s1017_s22 = scalar_lea.vmem [#allocation20], %s4336_s17 }
  0xae   : > { %3914 = vsyncadd (%p4850_p2), [#allocation10], 4294966272  ;;  %s4852_s23 = sld [smem:[#allocation59_spill]] }
  0xaf   : > { %s4853_s7 = sld [smem:[#allocation63_spill]] }
  0xb0   : > { %s4854_s19 = sld [smem:[#allocation65_spill]] }
  0xb1   : > { %s4855_s10 = sld [smem:[#allocation67_spill]] }
  0xb3   : > { %p1018_p6 = scmp.lt.s32.totalorder %s4851_s28, 1  ;;  %p2637_p8 = scmp.ne.s32.totalorder %s4851_s28, 0 }
  0xb5   : > { %s4440_s20 = scalar_select %p1018_p6, %s4851_s28, 1 }
  0xb6   : > { %1035 = sbr.rel (%p2637_p8) target bundleno = 455 (0x1c7), region = 148 }
  0xb7   : > { %s1020_s29 = scalar_lea.vmem %s4852_s23, %s4440_s20  ;;  %s2636_s1 = sshll.u32 %s4440_s20, 2 }
  0xb8   : > { %s4450_s5 = scalar_lea.vmem %s4853_s7, %s2636_s1  ;;  %s1027_s6 = scalar_lea.vmem %s4854_s19, %s4440_s20 }
  0xb9   : > { %s1030_s16 = scalar_lea.vmem %s4855_s10, %s4440_s20 }
  0xbb   : > { %v1036_v0 = vld [vmem:[%s4341_s25] sm:$0xff]  ;;  %v3972_v1 = vmov 128.0   ;;  %v3366_v21 = vld [vmem:[#allocation8] ss:$0 sm:$0xff]  ;;  %v3367_v23 = vld [vmem:[#allocation9] ss:$0 sm:$0xff] }
  0xbc   : > { %1039 = vadd.xlane.f32.xlu0 %v1036_v0  ;;  %3368 = vrcp.f32 %v3972_v1 }
  0xc2   : > { %v3369_v2 = vpop.eup %3368 }
  0xc3   : > { %v1042_v3 = vmul.f32 128.0, %v3369_v2  ;;  %vm1046_vm0 = vweird.f32 %v3369_v2 }
  0xc5   : > { %v1043_v4 = vsub.f32 1.0, %v1042_v3 }
  0xc7   : > { %v1044_v5 = vmul.f32 %v3369_v2, %v1043_v4 }
  0xc9   : > { %v1045_v6 = vadd.f32 %v3369_v2, %v1044_v5 }
  0xcb   : > { %v1047_v7 = vsel %vm1046_vm0, %v3369_v2, %v1045_v6 }
 0x12f   : > { %v1040_v8 = vpop.xlane.xlu0 %1039 }
 0x130   : > { %v1048_v9 = vmul.f32 %v1047_v7, %v1040_v8 }
 0x132   : > { %v1049_v10 = vsub.f32 %v1036_v0, %v1048_v9 }
 0x134   : > { %v1050_v11 = vmul.f32 %v1049_v10, %v1049_v10 }
 0x136   : > { %1051 = vadd.xlane.f32.xlu0 %v1050_v11 }
 0x1a9   : > { %v1052_v12 = vpop.xlane.xlu0 %1051 }
 0x1aa   : > { %v1053_v13 = vmul.f32 %v1052_v12, %v1047_v7 }
 0x1ac   : > { %v1054_v14 = vadd.f32 1e-12, %v1053_v13 }
 0x1ae   : > { %3370 = vrsqrt.f32 %v1054_v14  ;;  %vm1061_vm2 = vweird.f32 %v1054_v14 }
 0x1b4   : > { %v3371_v15 = vpop.eup %3370 }
 0x1b5   : > { %v1056_v16 = vmul.f32 %v3371_v15, %v1054_v14  ;;  %vm1062_vm1 = vweird.f32 %v3371_v15 }
 0x1b6   : > { %vm1063_vm3 = vmor %vm1061_vm2, %vm1062_vm1 }
 0x1b7   : > { %v1057_v17 = vmul.f32 %v3371_v15, %v1056_v16 }
 0x1b9   : > { %v1058_v18 = vmul.f32 0.5, %v1057_v17 }
 0x1bb   : > { %v1059_v19 = vsub.f32 1.5, %v1058_v18 }
 0x1bd   : > { %v1060_v20 = vmul.f32 %v3371_v15, %v1059_v19 }
 0x1bf   : > { %v1064_v22 = vsel %vm1063_vm3, %v3371_v15, %v1060_v20 }
 0x1c0   : > { %v1065_v24 = vmul.f32 %v1064_v22, %v1049_v10 }
 0x1c2   : > { %v1069_v25 = vmul.f32 %v3366_v21, %v1065_v24 }
 0x1c4   : > { %v1073_v26 = vadd.f32 %v3367_v23, %v1069_v25 }
 0x1c6   : > { %1074 = vst [vmem:[#allocation2] sm:$0xff] %v1073_v26 }
 0x1c7 PF: > { %v2724_v27 = vld [vmem:[%s4370_s14 + $0xa8] sm:$0xf]  ;;  %v3091_v28 = vld [vmem:[%s4370_s14 + $0xb0] sm:$0xf0]  ;;  %v3090_v29 = vld [vmem:[%s4370_s14 + $0xac] sm:$0xf] }
 0x1c8   : > { %v2725_v30 = vor.u32 %v3091_v28, %v2724_v27  ;;  %v2726_v31 = vld [vmem:[%s4370_s14 + $0xb4] sm:$0xf0]  ;;  %v2712_v32 = vld [vmem:[%s4370_s14 + $0x90] sm:$0xf]  ;;  %v3088_v33 = vld [vmem:[%s4370_s14 + $0x98] sm:$0xf0] }
 0x1c9   : > { %v2729_v34 = vor.u32 %v3090_v29, %v2726_v31  ;;  %v3087_v35 = vld [vmem:[%s4370_s14 + $0x94] sm:$0xf]  ;;  %v2714_v36 = vld [vmem:[%s4370_s14 + $0x9c] sm:$0xf0]  ;;  %v2713_v37 = vor.u32 %v3088_v33, %v2712_v32  ;;  %v2700_v39 = vld [vmem:[%s4370_s14 + $0x78] sm:$0xf] }
 0x1ca   : > { %1245 = vmatpush.bf16.msra.mxu0 %v2725_v30  ;;  %v2717_v38 = vor.u32 %v3087_v35, %v2714_v36  ;;  %v3085_v40 = vld [vmem:[%s4370_s14 + $0x80] sm:$0xf0]  ;;  %v3084_v41 = vld [vmem:[%s4370_s14 + $0x7c] sm:$0xf]  ;;  %v2702_v42 = vld [vmem:[%s4370_s14 + $0x84] sm:$0xf0] }
 0x1cb   : > { %1258 = vmatpush.bf16.msra.mxu1 %v2729_v34  ;;  %v2701_v43 = vor.u32 %v3085_v40, %v2700_v39  ;;  %v2705_v44 = vor.u32 %v3084_v41, %v2702_v42  ;;  %v2688_v45 = vld [vmem:[%s4370_s14 + $0x60] sm:$0xf]  ;;  %v3082_v46 = vld [vmem:[%s4370_s14 + $0x68] sm:$0xf0]  ;;  %v3081_v47 = vld [vmem:[%s4370_s14 + $0x64] sm:$0xf] }
 0x1cc   : > { %v2690_v48 = vld [vmem:[%s4370_s14 + $0x6c] sm:$0xf0]  ;;  %v2689_v49 = vor.u32 %v3082_v46, %v2688_v45  ;;  %v3092_v51 = vld [vmem:[%s4370_s14 + $0xb8] sm:$0xf0]  ;;  %v2720_v52 = vld [vmem:[%s4370_s14 + $0x98] sm:$0xf] }
 0x1cd   : > { %v2732_v50 = vld [vmem:[%s4370_s14 + $0xb0] sm:$0xf]  ;;  %v2693_v53 = vor.u32 %v3081_v47, %v2690_v48  ;;  %v2676_v54 = vld [vmem:[%s4370_s14 + $0x48] sm:$0xf]  ;;  %v3079_v55 = vld [vmem:[%s4370_s14 + $0x50] sm:$0xf0] }
 0x1ce   : > { %1246 = vmatpush.bf16.msra.mxu0 %v2713_v37  ;;  %v2733_v56 = vor.u32 %v3092_v51, %v2732_v50  ;;  %v3089_v57 = vld [vmem:[%s4370_s14 + $0xa0] sm:$0xf0]  ;;  %v3078_v58 = vld [vmem:[%s4370_s14 + $0x4c] sm:$0xf]  ;;  %v2678_v59 = vld [vmem:[%s4370_s14 + $0x54] sm:$0xf0]  ;;  %v2677_v61 = vor.u32 %v3079_v55, %v2676_v54 }
 0x1cf   : > { %1259 = vmatpush.bf16.msra.mxu1 %v2717_v38  ;;  %v2721_v60 = vor.u32 %v3089_v57, %v2720_v52  ;;  %v2664_v62 = vld [vmem:[%s4370_s14 + $0x30] sm:$0xf]  ;;  %v2708_v63 = vld [vmem:[%s4370_s14 + $0x80] sm:$0xf]  ;;  %v3086_v0 = vld [vmem:[%s4370_s14 + $0x88] sm:$0xf0]  ;;  %v2681_v1 = vor.u32 %v3078_v58, %v2678_v59 }
 0x1d0   : > { %1271 = vmatpush.bf16.msra.mxu2 %v2733_v56  ;;  %v3076_v2 = vld [vmem:[%s4370_s14 + $0x38] sm:$0xf0]  ;;  %v3075_v3 = vld [vmem:[%s4370_s14 + $0x34] sm:$0xf]  ;;  %v2666_v4 = vld [vmem:[%s4370_s14 + $0x3c] sm:$0xf0]  ;;  %v2709_v5 = vor.u32 %v3086_v0, %v2708_v63 }
 0x1d1   : > { %v2665_v6 = vor.u32 %v3076_v2, %v2664_v62  ;;  %v2696_v7 = vld [vmem:[%s4370_s14 + $0x68] sm:$0xf]  ;;  %v3083_v8 = vld [vmem:[%s4370_s14 + $0x70] sm:$0xf0]  ;;  %v2669_v9 = vor.u32 %v3075_v3, %v2666_v4  ;;  %v2652_v10 = vld [vmem:[%s4370_s14 + $0x18] sm:$0xf] }
 0x1d2   : > { %1247 = vmatpush.bf16.msra.mxu0 %v2701_v43  ;;  %v3073_v11 = vld [vmem:[%s4370_s14 + $0x20] sm:$0xf0]  ;;  %v3072_v12 = vld [vmem:[%s4370_s14 + $0x1c] sm:$0xf]  ;;  %v2654_v13 = vld [vmem:[%s4370_s14 + $0x24] sm:$0xf0]  ;;  %v2697_v14 = vor.u32 %v3083_v8, %v2696_v7 }
 0x1d3   : > { %1260 = vmatpush.bf16.msra.mxu1 %v2705_v44  ;;  %v2653_v15 = vor.u32 %v3073_v11, %v2652_v10  ;;  %v2684_v16 = vld [vmem:[%s4370_s14 + $0x50] sm:$0xf]  ;;  %v3080_v17 = vld [vmem:[%s4370_s14 + $0x58] sm:$0xf0]  ;;  %v2657_v18 = vor.u32 %v3072_v12, %v2654_v13  ;;  %v2640_v19 = vld [vmem:[%s4370_s14] sm:$0xf] }
 0x1d4   : > { %1272 = vmatpush.bf16.msra.mxu2 %v2721_v60  ;;  %v3070_v20 = vld [vmem:[%s4370_s14 + $0x8] sm:$0xf0]  ;;  %v3069_v21 = vld [vmem:[%s4370_s14 + $0x4] sm:$0xf]  ;;  %v2642_v22 = vld [vmem:[%s4370_s14 + $0xc] sm:$0xf0]  ;;  %v2685_v23 = vor.u32 %v3080_v17, %v2684_v16 }
 0x1d5   : > { %v2641_v24 = vor.u32 %v3070_v20, %v2640_v19  ;;  %v4505_v25 = vld [vmem:[#allocation2] sm:$0xff]  ;;  %v2672_v26 = vld [vmem:[%s4370_s14 + $0x38] sm:$0xf]  ;;  %v2645_v28 = vor.u32 %v3069_v21, %v2642_v22  ;;  %v3074_v32 = vld [vmem:[%s4370_s14 + $0x28] sm:$0xf0]  ;;  %vm1305_vm4 = vcmask 523264  }
 0x1d6   : > { %1248 = vmatpush.bf16.msra.mxu0 %v2689_v49  ;;  %v3077_v27 = vld [vmem:[%s4370_s14 + $0x40] sm:$0xf0]  ;;  %v1076_v29 = vpack.c.bf16 %v4505_v25, %v4505_v25  ;;  %v2660_v31 = vld [vmem:[%s4370_s14 + $0x20] sm:$0xf]  ;;  %v2648_v34 = vld [vmem:[%s4370_s14 + $0x8] sm:$0xf] }
 0x1d7   : > { %1261 = vmatpush.bf16.msra.mxu1 %v2693_v53  ;;  %v2673_v30 = vor.u32 %v3077_v27, %v2672_v26  ;;  %v2661_v33 = vor.u32 %v3074_v32, %v2660_v31  ;;  %v3071_v35 = vld [vmem:[%s4370_s14 + $0x10] sm:$0xf0]  ;;  %v1109_v37 = vld [vmem:[%s4379_s18] sm:$0x7]  ;;  %s3973_s8 = smov 64   ;;  %s4856_s9 = scalar_lea.vmem [#allocation6], %s4336_s17 }
 0x1d8   : > { %1273 = vmatpush.bf16.msra.mxu2 %v2709_v5  ;;  %v2649_v36 = vor.u32 %v3071_v35, %v2648_v34  ;;  %v1111_v38 = vperm.slane %v1109_v37, 0  ;;  %v1112_v39 = vperm.slane %v1109_v37, 1  ;;  %v1113_v47 = vperm.slane %v1109_v37, 2  ;;  %v3372_v52 = vld [vmem:[%s4856_s9] ss:$0 sm:$0xff]  ;;  %v3095_v62 = vld [vmem:[%s4388_s26 + $0x10] sm:$0xff] }
 0x1d9   : > { %vm1332_vm5 = vcmask 64512   ;;  %v3094_v63 = vld [vmem:[%s4388_s26 + $0x8] sm:$0xff]  ;;  %v3093_v5 = vld [vmem:[%s4388_s26] sm:$0xff]  ;;  %v3099_v19 = vld [vmem:[%s4388_s26 + $0x30] sm:$0xff]  ;;  %v3974_v34 = vmov 128.0   ;;  %s4858_s14 = scalar_lea.vmem [#allocation14], %s4367_s15 }
 0x1da   : > { %1249 = vmatpush.bf16.msra.mxu0 %v2677_v61  ;;  %v3096_v61 = vld [vmem:[%s4388_s26 + $0x18] sm:$0xff]  ;;  %v3098_v20 = vld [vmem:[%s4388_s26 + $0x28] sm:$0xff]  ;;  %v2888_v35 = vld [vmem:[%s4411_s3 + $0xe0] sm:$0xf]  ;;  %s4859_s18 = scalar_lea.vmem [#allocation15], %s4367_s15  ;;  %s4863_s28 = sld [smem:[#allocation39_spill]] }
 0x1db   : > { %1262 = vmatpush.bf16.msra.mxu1 %v2681_v1  ;;  %v3129_v37 = vld [vmem:[%s4411_s3 + $0xe4] sm:$0xf] }
 0x1dc   : > { %1274 = vmatpush.bf16.msra.mxu2 %v2697_v14 }
 0x1de   : > { %1250 = vmatpush.bf16.msra.mxu0 %v2665_v6 }
 0x1df   : > { %1263 = vmatpush.bf16.msra.mxu1 %v2669_v9 }
 0x1e0   : > { %1275 = vmatpush.bf16.msra.mxu2 %v2685_v23  ;;  %p3030_p10 = scmp.ge.s32.totalorder %s4863_s28, 1 }
 0x1e2   : > { %1251 = vmatpush.bf16.msra.mxu0 %v2653_v15 }
 0x1e3   : > { %1264 = vmatpush.bf16.msra.mxu1 %v2657_v18  ;;  %v3100_v18 = vld [vmem:[%s4388_s26 + $0x38] sm:$0xff] }
 0x1e4   : > { %1276 = vmatpush.bf16.msra.mxu2 %v2673_v30 }
 0x1e6   : > { %1252 = vmatpush.bf16.msra.mxu0 %v2641_v24  ;;  %v3097_v24 = vld [vmem:[%s4388_s26 + $0x20] sm:$0xff] }
 0x1e7   : > { %1265 = vmatpush.bf16.msra.mxu1 %v2645_v28  ;;  %v3373_v28 = vld [vmem:[%s1020_s29] ss:$0 sm:$0xff] }
 0x1e8   : > { %1277 = vmatpush.bf16.msra.mxu2 %v2661_v33 }
 0x1e9   : > { %1253 = vmatmul.bf16.vlgmr.msra.gmra.mxu0 %v1076_v29 }
 0x1ea   : > { %1266 = vmatmul.bf16.vlgmr.msra.gmra.mxu1 %v1076_v29  ;;  %1506 = vmatpush.bf16.msrb.mxu0 %v3096_v61  ;;  %v2880_v61 = vld [vmem:[%s4411_s3 + $0xc8] sm:$0xf] }
 0x1ec   : > { %1278 = vmatpush.bf16.msra.mxu2 %v2649_v36  ;;  %v3131_v36 = vld [vmem:[%s4411_s3 + $0xec] sm:$0xf0] }
 0x1ee   : > { %1507 = vmatpush.bf16.msrb.mxu0 %v3095_v62  ;;  %v3128_v62 = vld [vmem:[%s4411_s3 + $0xd4] sm:$0xf0] }
 0x1ef   : > { %1279 = vmatmul.bf16.vlgmr.msra.gmra.mxu2 %v1076_v29 }
 0x1f2   : > { %1508 = vmatpush.bf16.msrb.mxu0 %v3094_v63 }
 0x1f6   : > { %1509 = vmatpush.bf16.msrb.mxu0 %v3093_v5  ;;  %v3123_v5 = vld [vmem:[%s4411_s3 + $0xac] sm:$0xf0] }
 0x266   : > { %v1254_v40 = vpop.f32.mrf.mxu0 }
 0x267   : > { %v1255_v41 = vadd.f32 %v1254_v40, %v1111_v38  ;;  %v1267_v42 = vpop.f32.mrf.mxu1  ;;  %v2889_v38 = vor.u32 %v3131_v36, %v2888_v35  ;;  %v2896_v40 = vld [vmem:[%s4411_s3 + $0xe8] sm:$0xf]  ;;  %v3116_v35 = vld [vmem:[%s4411_s3 + $0x74] sm:$0xf0] }
 0x268   : > { %v1268_v43 = vadd.f32 %v1267_v42, %v1112_v39  ;;  %v2890_v39 = vld [vmem:[%s4411_s3 + $0xf0] sm:$0xf0] }
 0x269   : > { %v1284_v44 = vmul.f32 0.125, %v1255_v41  ;;  %v3132_v41 = vld [vmem:[%s4411_s3 + $0xf4] sm:$0xf0]  ;;  %v2893_v42 = vor.u32 %v3129_v37, %v2890_v39  ;;  %1761 = vmatpush.bf16.msrb.mxu1 %v2889_v38  ;;  %v3114_v38 = vld [vmem:[%s4411_s3 + $0x6c] sm:$0xf] }
 0x26a   : > { %1370 = vrot.lane.b32.xlu1 %v1268_v43, %s3973_s8  ;;  %2734 = vmatpush.xpose.msk.msra.mxu3 %vm1305_vm4, %v1268_v43  ;;  %v2897_v43 = vor.u32 %v3132_v41, %v2896_v40  ;;  %v2834_v39 = vld [vmem:[%s4411_s3 + $0x78] sm:$0xf0]  ;;  %v2808_v41 = vld [vmem:[%s4411_s3 + $0x40] sm:$0xf] }
 0x26b   : > { %1774 = vmatpush.bf16.msrb.mxu2 %v2893_v42  ;;  %v2837_v40 = vor.u32 %v3114_v38, %v2834_v39  ;;  %v3111_v42 = vld [vmem:[%s4411_s3 + $0x4c] sm:$0xf0] }
 0x26c   : > { %v3147_v38 = vld [vmem:[%s4419_s30 + $0x70] sm:$0xff] }
 0x26d   : > { %2735 = vmatmul.msk.f32.vlgmr.msra.gmra.mxu3 %vm1305_vm4, %v1284_v44  ;;  %v3155_v39 = vld [vmem:[%s4419_s30 + $0xb0] sm:$0xff] }
 0x26e   : > { %v1256_v45 = vpop.f32.mrf.mxu0 }
 0x26f   : > { %v1269_v46 = vpop.f32.mrf.mxu1  ;;  %v2898_v45 = vld [vmem:[%s4411_s3 + $0xf8] sm:$0xf0] }
 0x272   : > { %1368 = vrot.lane.b32.xlu1 %v1284_v44, %s3973_s8  ;;  %v1280_v48 = vpop.f32.mrf.mxu2  ;;  %v3130_v44 = vld [vmem:[%s4411_s3 + $0xec] sm:$0xf] }
 0x273   : > { %v1281_v49 = vadd.f32 %v1280_v48, %v1113_v47  ;;  %v2901_v46 = vor.u32 %v3130_v44, %v2898_v45  ;;  %v2809_v44 = vor.u32 %v3111_v42, %v2808_v41  ;;  %v2810_v45 = vld [vmem:[%s4411_s3 + $0x50] sm:$0xf0]  ;;  %v3161_v41 = vld [vmem:[%s4419_s30 + $0xe0] sm:$0xff]  ;;  %v3146_v42 = vld [vmem:[%s4419_s30 + $0x68] sm:$0xff] }
 0x275   : > { %1362 = vmatpush.msrb.mxu3 %v1281_v49  ;;  %1800 = vmatpush.bf16.msra.mxu0 %v2901_v46  ;;  %v2816_v46 = vld [vmem:[%s4411_s3 + $0x48] sm:$0xf] }
 0x27a   : > { %v1282_v50 = vpop.f32.mrf.mxu2 }
 0x2dc   : > { %v1371_v51 = vpop.permute.xlu1 %1370 }
 0x2dd   : > { %2737 = vmatpush.xpose.msk.msra.mxu3 %vm1305_vm4, %v1371_v51 }
 0x2e4   : > { %v1369_v3 = vpop.permute.xlu1 %1368 }
 0x2f0   : > { %v1329_v53 = vpop.f32.mrf.mxu3 }
 0x2f1   : > { %v1330_v54 = vadd.f32 %v3372_v52, %v1329_v53 }
 0x2f3   : > { %v1333_v55 = vsel %vm1332_vm5, %v1330_v54, -inf }
 0x2f4   : > { %1334 = vmax.xlane.f32.xlu0 %v1333_v55 }
 0x367   : > { %v1335_v56 = vpop.xlane.xlu0 %1334 }
 0x368   : > { %v1336_v57 = vsub.f32 %v1330_v54, %v1335_v56  ;;  %v2872_v56 = vld [vmem:[%s4411_s3 + $0xc0] sm:$0xf] }
 0x36a   : > { %v1337_v58 = vmul.f32 1.442695, %v1336_v57  ;;  %v3127_v57 = vld [vmem:[%s4411_s3 + $0xcc] sm:$0xf0] }
 0x36c   : > { %3379 = vpow2.f32 %v1337_v58  ;;  %v3125_v58 = vld [vmem:[%s4411_s3 + $0xc4] sm:$0xf] }
 0x372   : > { %v3380_v59 = vpop.eup %3379 }
 0x373   : > { %v1339_v60 = vsel %vm1332_vm5, %v3380_v59, 0.0 }
 0x374   : > { %1340 = vadd.xlane.f32.xlu0 %v1339_v60  ;;  %v2874_v60 = vld [vmem:[%s4411_s3 + $0xd0] sm:$0xf0] }
 0x375   : > { %v2877_v63 = vor.u32 %v3125_v58, %v2874_v60  ;;  %v2794_v58 = vld [vmem:[%s4411_s3 + $0x30] sm:$0xf0]  ;;  %v3108_v60 = vld [vmem:[%s4411_s3 + $0x34] sm:$0xf0] }
 0x377   : > { %1775 = vmatpush.bf16.msrb.mxu2 %v2877_v63  ;;  %v3106_v63 = vld [vmem:[%s4411_s3 + $0x2c] sm:$0xf] }
 0x388   : > { %1408 = vrot.lane.b32.xlu0 %v1281_v49, %s3973_s8 }
 0x3e7   : > { %v1341_v0 = vpop.xlane.xlu0 %1340 }
 0x3e8   : > { %3381 = vrcp.f32 %v1341_v0  ;;  %v2881_v0 = vor.u32 %v3128_v62, %v2880_v61 }
 0x3ee   : > { %v3382_v1 = vpop.eup %3381 }
 0x3ef   : > { %v1343_v2 = vmul.f32 %v3382_v1, %v3380_v59  ;;  %v2873_v59 = vor.u32 %v3127_v57, %v2872_v56  ;;  %v3126_v1 = vld [vmem:[%s4411_s3 + $0xcc] sm:$0xf]  ;;  %v3105_v56 = vld [vmem:[%s4411_s3 + $0x24] sm:$0xf] }
 0x3f0   : > { %v2797_v61 = vor.u32 %v3105_v56, %v2794_v58  ;;  %v3151_v56 = vld [vmem:[%s4419_s30 + $0x90] sm:$0xff]  ;;  %v3157_v58 = vld [vmem:[%s4419_s30 + $0xc0] sm:$0xff] }
 0x3f1   : > { %2736 = vmatmul.msk.f32.vlgmr.msrb.gmra.mxu3 %vm1332_vm5, %v1343_v2  ;;  %v2882_v2 = vld [vmem:[%s4411_s3 + $0xd8] sm:$0xf0]  ;;  %1762 = vmatpush.bf16.msrb.mxu1 %v2873_v59  ;;  %v2800_v59 = vld [vmem:[%s4411_s3 + $0x28] sm:$0xf] }
 0x3f2   : > { %v2801_v62 = vor.u32 %v3108_v60, %v2800_v59  ;;  %v3142_v59 = vld [vmem:[%s4419_s30 + $0x48] sm:$0xff] }
 0x3f3   : > { %v3150_v60 = vld [vmem:[%s4419_s30 + $0x88] sm:$0xff] }
 0x3f9   : > { %2738 = vmatmul.msk.f32.vlgmr.msra.gmra.mxu3 %vm1305_vm4, %v1369_v3  ;;  %v2885_v3 = vor.u32 %v3126_v1, %v2882_v2  ;;  %v2776_v1 = vld [vmem:[%s4411_s3] sm:$0xf] }
 0x3fa   : > { %v1409_v4 = vpop.permute.xlu0 %1408 }
 0x3fb   : > { %1429 = vmatpush.msrb.mxu3 %v1409_v4  ;;  %v2856_v4 = vld [vmem:[%s4411_s3 + $0xa0] sm:$0xf]  ;;  %1801 = vmatpush.bf16.msra.mxu0 %v2885_v3  ;;  %v3103_v3 = vld [vmem:[%s4411_s3 + $0xc] sm:$0xf0] }
 0x3fd   : > { %1466 = vmatpush.bf16.msra.mxu3 %v3100_v18  ;;  %v3117_v18 = vld [vmem:[%s4411_s3 + $0x84] sm:$0xf] }
 0x401   : > { %1467 = vmatpush.bf16.msra.mxu3 %v3099_v19 }
 0x405   : > { %1468 = vmatpush.bf16.msra.mxu3 %v3098_v20  ;;  %v2842_v20 = vld [vmem:[%s4411_s3 + $0x90] sm:$0xf0] }
 0x409   : > { %1469 = vmatpush.bf16.msra.mxu3 %v3097_v24 }
 0x474   : > { %v1364_v6 = vpop.f32.mrf.mxu3 }
 0x475   : > { %v1367_v7 = vpack.c.bf16 %v1364_v6, %v1364_v6  ;;  %v3121_v6 = vld [vmem:[%s4411_s3 + $0xa4] sm:$0xf] }
 0x477   : > { %2773 = vmatmul.msk.bf16.vlgmr.msrb.gmra.mxu0 %vm1305_vm4, %v1367_v7  ;;  %v2857_v7 = vor.u32 %v3123_v5, %v2856_v4  ;;  %v3101_v4 = vld [vmem:[%s4411_s3 + $0x4] sm:$0xf]  ;;  %v2778_v5 = vld [vmem:[%s4411_s3 + $0x10] sm:$0xf0] }
 0x479   : > { %1763 = vmatpush.bf16.msrb.mxu1 %v2857_v7  ;;  %v2781_v7 = vor.u32 %v3101_v4, %v2778_v5 }
 0x47c   : > { %v1393_v8 = vpop.f32.mrf.mxu3 }
 0x47d   : > { %v1394_v9 = vadd.f32 %v3372_v52, %v1393_v8  ;;  %v2858_v8 = vld [vmem:[%s4411_s3 + $0xb0] sm:$0xf0] }
 0x47f   : > { %v1396_v10 = vsel %vm1332_vm5, %v1394_v9, -inf }
 0x480   : > { %1397 = vmax.xlane.f32.xlu2 %v1396_v10  ;;  %v3124_v10 = vld [vmem:[%s4411_s3 + $0xb4] sm:$0xf0] }
 0x4f3   : > { %v1398_v11 = vpop.xlane.xlu2 %1397 }
 0x4f4   : > { %v1399_v12 = vsub.f32 %v1394_v9, %v1398_v11  ;;  %v1511_v13 = vpop.f32.mrf.mxu0  ;;  %v2864_v9 = vld [vmem:[%s4411_s3 + $0xa8] sm:$0xf]  ;;  %v2861_v11 = vor.u32 %v3121_v6, %v2858_v8  ;;  %v2777_v6 = vor.u32 %v3103_v3, %v2776_v1 }
 0x4f5   : > { %v2784_v8 = vld [vmem:[%s4411_s3 + $0x8] sm:$0xf] }
 0x4f6   : > { %v1400_v14 = vmul.f32 1.442695, %v1399_v12  ;;  %v2865_v12 = vor.u32 %v3124_v10, %v2864_v9  ;;  %1776 = vmatpush.bf16.msrb.mxu2 %v2861_v11  ;;  %v3104_v9 = vld [vmem:[%s4411_s3 + $0x14] sm:$0xf0]  ;;  %v3102_v10 = vld [vmem:[%s4411_s3 + $0xc] sm:$0xf] }
 0x4f7   : > { %v2785_v11 = vor.u32 %v3104_v9, %v2784_v8 }
 0x4f8   : > { %3383 = vpow2.f32 %v1400_v14  ;;  %v2866_v14 = vld [vmem:[%s4411_s3 + $0xb8] sm:$0xf0] }
 0x4fc   : > { %v1513_v15 = vpop.f32.mrf.mxu0 }
 0x4fe   : > { %v3384_v16 = vpop.eup %3383 }
 0x4ff   : > { %v1402_v17 = vsel %vm1332_vm5, %v3384_v16, 0.0 }
 0x500   : > { %1403 = vadd.xlane.f32.xlu2 %v1402_v17  ;;  %v3119_v17 = vld [vmem:[%s4411_s3 + $0x8c] sm:$0xf0] }
 0x573   : > { %v1404_v21 = vpop.xlane.xlu2 %1403 }
 0x574   : > { %3385 = vrcp.f32 %v1404_v21  ;;  %v2848_v21 = vld [vmem:[%s4411_s3 + $0x88] sm:$0xf] }
 0x575   : > { %3387 = vrcp.f32 %v3974_v34  ;;  %v2832_v34 = vld [vmem:[%s4411_s3 + $0x68] sm:$0xf] }
 0x576   : > { %v2833_v37 = vor.u32 %v3116_v35, %v2832_v34  ;;  %v3163_v34 = vld [vmem:[%s4419_s30 + $0xf0] sm:$0xff]  ;;  %v3156_v35 = vld [vmem:[%s4419_s30 + $0xb8] sm:$0xff] }
 0x57a   : > { %v3386_v22 = vpop.eup %3385 }
 0x57b   : > { %v1406_v23 = vmul.f32 %v3386_v22, %v3384_v16  ;;  %v3388_v47 = vpop.eup %3387  ;;  %v2840_v16 = vld [vmem:[%s4411_s3 + $0x80] sm:$0xf]  ;;  %v3120_v22 = vld [vmem:[%s4411_s3 + $0x94] sm:$0xf0] }
 0x57c   : > { %vm1530_vm6 = vweird.f32 %v3388_v47  ;;  %v2841_v19 = vor.u32 %v3119_v17, %v2840_v16  ;;  %v2849_v24 = vor.u32 %v3120_v22, %v2848_v21  ;;  %v3164_v16 = vld [vmem:[%s4419_s30 + $0xf8] sm:$0xff] }
 0x57d   : > { %2739 = vmatmul.msk.f32.vlgmr.msrb.gmra.mxu3 %vm1332_vm5, %v1406_v23  ;;  %v2845_v23 = vor.u32 %v3117_v18, %v2842_v20 }
 0x57e   : > { %1787 = vmatpush.bf16.msrb.mxu3 %v2897_v43  ;;  %1764 = vmatpush.bf16.msrb.mxu1 %v2841_v19  ;;  %v3109_v43 = vld [vmem:[%s4411_s3 + $0x44] sm:$0xf] }
 0x57f   : > { %1777 = vmatpush.bf16.msrb.mxu2 %v2845_v23 }
 0x582   : > { %1788 = vmatpush.bf16.msrb.mxu3 %v2881_v0  ;;  %v2802_v0 = vld [vmem:[%s4411_s3 + $0x38] sm:$0xf0] }
 0x583   : > { %v2805_v2 = vor.u32 %v3106_v63, %v2802_v0  ;;  %v3141_v63 = vld [vmem:[%s4419_s30 + $0x40] sm:$0xff] }
 0x584   : > { %v3149_v0 = vld [vmem:[%s4419_s30 + $0x80] sm:$0xff] }
 0x586   : > { %1789 = vmatpush.bf16.msrb.mxu3 %v2865_v12  ;;  %v2786_v12 = vld [vmem:[%s4411_s3 + $0x18] sm:$0xf0] }
 0x58a   : > { %1790 = vmatpush.bf16.msrb.mxu3 %v2849_v24 }
 0x58e   : > { %1791 = vmatpush.bf16.msrb.mxu3 %v2833_v37  ;;  %v3162_v37 = vld [vmem:[%s4419_s30 + $0xe8] sm:$0xff] }
 0x600   : > { %v1431_v26 = vpop.f32.mrf.mxu3 }
 0x601   : > { %v1434_v27 = vpack.c.bf16 %v1431_v26, %v1431_v26  ;;  %v3118_v26 = vld [vmem:[%s4411_s3 + $0x8c] sm:$0xf] }
 0x603   : > { %2756 = vmatmul.msk.bf16.vlgmr.msra.gmra.mxu3 %vm1305_vm4, %v1434_v27  ;;  %v2850_v27 = vld [vmem:[%s4411_s3 + $0x98] sm:$0xf0] }
 0x686   : > { %v1471_v29 = vpop.f32.mrf.mxu3 }
 0x687   : > { %v1512_v30 = vadd.f32 %v1511_v13, %v1471_v29  ;;  %v3122_v13 = vld [vmem:[%s4411_s3 + $0xac] sm:$0xf]  ;;  %v2824_v29 = vld [vmem:[%s4411_s3 + $0x60] sm:$0xf] }
 0x688   : > { %v2869_v15 = vor.u32 %v3122_v13, %v2866_v14  ;;  %v2789_v13 = vor.u32 %v3102_v10, %v2786_v12 }
 0x689   : > { %v1519_v31 = vadd.f32 %v3373_v28, %v1512_v30  ;;  %v2853_v28 = vor.u32 %v3118_v26, %v2850_v27  ;;  %v3115_v30 = vld [vmem:[%s4411_s3 + $0x6c] sm:$0xf0]  ;;  %v3374_v26 = vld [vmem:[%s4858_s14] ss:$0 sm:$0xff] }
 0x68a   : > { %1802 = vmatpush.bf16.msra.mxu0 %v2869_v15  ;;  %v3140_v15 = vld [vmem:[%s4419_s30 + $0x38] sm:$0xff] }
 0x68b   : > { %v1520_v32 = vadd.f32 %v1519_v31, %v4505_v25  ;;  %v1526_v25 = vmul.f32 128.0, %v3388_v47  ;;  %v3113_v31 = vld [vmem:[%s4411_s3 + $0x64] sm:$0xf] }
 0x68d   : > { %1523 = vadd.xlane.f32.xlu1 %v1520_v32  ;;  %v1527_v48 = vsub.f32 1.0, %v1526_v25  ;;  %v2813_v25 = vor.u32 %v3109_v43, %v2810_v45  ;;  %v3154_v43 = vld [vmem:[%s4419_s30 + $0xa8] sm:$0xff]  ;;  %v3160_v45 = vld [vmem:[%s4419_s30 + $0xd8] sm:$0xff] }
 0x68e   : > { %v1473_v33 = vpop.f32.mrf.mxu3  ;;  %1803 = vmatpush.bf16.msra.mxu0 %v2853_v28 }
 0x68f   : > { %v1528_v49 = vmul.f32 %v3388_v47, %v1527_v48  ;;  %v2826_v33 = vld [vmem:[%s4411_s3 + $0x70] sm:$0xf0] }
 0x690   : > { %v2829_v36 = vor.u32 %v3113_v31, %v2826_v33  ;;  %v3139_v33 = vld [vmem:[%s4419_s30 + $0x30] sm:$0xff] }
 0x691   : > { %v1529_v50 = vadd.f32 %v3388_v47, %v1528_v49  ;;  %v3110_v49 = vld [vmem:[%s4411_s3 + $0x4c] sm:$0xf] }
 0x692   : > { %1778 = vmatpush.bf16.msrb.mxu2 %v2829_v36  ;;  %1804 = vmatpush.bf16.msra.mxu0 %v2837_v40  ;;  %v3138_v36 = vld [vmem:[%s4419_s30 + $0x28] sm:$0xff]  ;;  %v3137_v40 = vld [vmem:[%s4419_s30 + $0x20] sm:$0xff] }
 0x693   : > { %v4552_v51 = vsel %vm1530_vm6, %v3388_v47, %v1529_v50  ;;  %v3112_v47 = vld [vmem:[%s4411_s3 + $0x54] sm:$0xf0]  ;;  %v2818_v50 = vld [vmem:[%s4411_s3 + $0x58] sm:$0xf0] }
 0x694   : > { %v2817_v48 = vor.u32 %v3112_v47, %v2816_v46  ;;  %v3145_v46 = vld [vmem:[%s4419_s30 + $0x60] sm:$0xff] }
 0x695   : > { %v3153_v47 = vld [vmem:[%s4419_s30 + $0xa0] sm:$0xff] }
 0x696   : > { %1779 = vmatpush.bf16.msrb.mxu2 %v2813_v25  ;;  %1792 = vmatpush.bf16.msrb.mxu3 %v2817_v48  ;;  %v3135_v25 = vld [vmem:[%s4419_s30 + $0x10] sm:$0xff] }
 0x697   : > { %v3159_v48 = vld [vmem:[%s4419_s30 + $0xd0] sm:$0xff] }
 0x69a   : > { %1780 = vmatpush.bf16.msrb.mxu2 %v2797_v61  ;;  %1793 = vmatpush.bf16.msrb.mxu3 %v2801_v62  ;;  %v1591_v61 = vld [vmem:[%s4450_s5] sm:$0xf] }
 0x69b   : > { %v1593_v62 = vperm.slane %v1591_v61, 0  ;;  %v1596_v1 = vperm.slane %v1591_v61, 3  ;;  %v1595_v9 = vperm.slane %v1591_v61, 2 }
 0x69e   : > { %1781 = vmatpush.bf16.msrb.mxu2 %v2781_v7  ;;  %1794 = vmatpush.bf16.msrb.mxu3 %v2785_v11  ;;  %v1594_v7 = vperm.slane %v1591_v61, 1 }
 0x6a2   : > { %2139 = vmatpush.bf16.msra.mxu3 %v3156_v35 }
 0x6a6   : > { %2140 = vmatpush.bf16.msra.mxu3 %v3155_v39 }
 0x6aa   : > { %2141 = vmatpush.bf16.msra.mxu3 %v3154_v43 }
 0x6ae   : > { %2142 = vmatpush.bf16.msra.mxu3 %v3153_v47 }
 0x700   : > { %v1524_v52 = vpop.xlane.xlu1 %1523 }
 0x701   : > { %v1532_v53 = vmul.f32 %v4552_v51, %v1524_v52  ;;  %v2821_v52 = vor.u32 %v3110_v49, %v2818_v50  ;;  %v3144_v49 = vld [vmem:[%s4419_s30 + $0x58] sm:$0xff] }
 0x702   : > { %v3152_v50 = vld [vmem:[%s4419_s30 + $0x98] sm:$0xff] }
 0x703   : > { %v4555_v54 = vsub.f32 %v1520_v32, %v1532_v53  ;;  %v2825_v32 = vor.u32 %v3115_v30, %v2824_v29  ;;  %v2792_v53 = vld [vmem:[%s4411_s3 + $0x20] sm:$0xf]  ;;  %1805 = vmatpush.bf16.msra.mxu0 %v2821_v52  ;;  %v3375_v29 = vld [vmem:[%s4859_s18] ss:$0 sm:$0xff]  ;;  %2143 = vmatpush.bf16.msra.mxu3 %v3152_v50  ;;  %v3134_v52 = vld [vmem:[%s4419_s30 + $0x8] sm:$0xff] }
 0x705   : > { %v1534_v55 = vmul.f32 %v4555_v54, %v4555_v54  ;;  %1765 = vmatpush.bf16.msrb.mxu1 %v2825_v32 }
 0x707   : > { %1535 = vadd.xlane.f32.xlu2 %v1534_v55  ;;  %v3107_v55 = vld [vmem:[%s4411_s3 + $0x2c] sm:$0xf0]  ;;  %1806 = vmatpush.bf16.msra.mxu0 %v2805_v2 }
 0x708   : > { %v2793_v57 = vor.u32 %v3107_v55, %v2792_v53  ;;  %v3158_v53 = vld [vmem:[%s4419_s30 + $0xc8] sm:$0xff]  ;;  %v3143_v55 = vld [vmem:[%s4419_s30 + $0x50] sm:$0xff]  ;;  %2144 = vmatpush.bf16.msra.mxu3 %v3151_v56 }
 0x709   : > { %1766 = vmatpush.bf16.msrb.mxu1 %v2809_v44  ;;  %v3136_v44 = vld [vmem:[%s4419_s30 + $0x18] sm:$0xff] }
 0x70b   : > { %1807 = vmatpush.bf16.msra.mxu0 %v2789_v13 }
 0x70c   : > { %2145 = vmatpush.bf16.msra.mxu3 %v3150_v60  ;;  %v3376_v60 = vld [vmem:[%s1027_s6] ss:$0 sm:$0xff]  ;;  %s4861_s6 = scalar_lea.vmem [#allocation18], %s4367_s15 }
 0x70d   : > { %1767 = vmatpush.bf16.msrb.mxu1 %v2793_v57  ;;  %v3133_v57 = vld [vmem:[%s4419_s30] sm:$0xff] }
 0x70f   : > { %2152 = vmatpush.bf16.msrb.mxu0 %v3164_v16 }
 0x710   : > { %2146 = vmatpush.bf16.msra.mxu3 %v3149_v0 }
 0x711   : > { %1768 = vmatpush.bf16.msrb.mxu1 %v2777_v6 }
 0x713   : > { %2153 = vmatpush.bf16.msrb.mxu0 %v3163_v34 }
 0x715   : > { %2113 = vmatpush.bf16.msra.mxu1 %v3140_v15 }
 0x717   : > { %2154 = vmatpush.bf16.msrb.mxu0 %v3162_v37 }
 0x719   : > { %2114 = vmatpush.bf16.msra.mxu1 %v3139_v33 }
 0x71b   : > { %2155 = vmatpush.bf16.msrb.mxu0 %v3161_v41 }
 0x71d   : > { %2115 = vmatpush.bf16.msra.mxu1 %v3138_v36 }
 0x71f   : > { %2156 = vmatpush.bf16.msrb.mxu0 %v3160_v45 }
 0x721   : > { %2116 = vmatpush.bf16.msra.mxu1 %v3137_v40 }
 0x723   : > { %2157 = vmatpush.bf16.msrb.mxu0 %v3159_v48 }
 0x725   : > { %2117 = vmatpush.bf16.msra.mxu1 %v3136_v44 }
 0x727   : > { %2158 = vmatpush.bf16.msrb.mxu0 %v3158_v53 }
 0x729   : > { %2118 = vmatpush.bf16.msra.mxu1 %v3135_v25 }
 0x72b   : > { %2159 = vmatpush.bf16.msrb.mxu0 %v3157_v58 }
 0x72d   : > { %2119 = vmatpush.bf16.msra.mxu1 %v3134_v52 }
 0x731   : > { %2120 = vmatpush.bf16.msra.mxu1 %v3133_v57 }
 0x77a   : > { %v1536_v14 = vpop.xlane.xlu2 %1535 }
 0x77b   : > { %v1537_v17 = vmul.f32 %v1536_v14, %v4552_v51 }
 0x77d   : > { %v1538_v18 = vadd.f32 1e-12, %v1537_v17 }
 0x77f   : > { %3389 = vrsqrt.f32 %v1538_v18  ;;  %vm1545_vm8 = vweird.f32 %v1538_v18 }
 0x785   : > { %v3390_v19 = vpop.eup %3389 }
 0x786   : > { %v1540_v20 = vmul.f32 %v3390_v19, %v1538_v18  ;;  %vm1546_vm7 = vweird.f32 %v3390_v19 }
 0x787   : > { %vm1547_vm9 = vmor %vm1545_vm8, %vm1546_vm7 }
 0x788   : > { %v1541_v21 = vmul.f32 %v3390_v19, %v1540_v20 }
 0x78a   : > { %v1542_v22 = vmul.f32 0.5, %v1541_v21 }
 0x78c   : > { %v1543_v23 = vsub.f32 1.5, %v1542_v22 }
 0x78e   : > { %v1544_v24 = vmul.f32 %v3390_v19, %v1543_v23 }
 0x790   : > { %v1548_v27 = vsel %vm1547_vm9, %v3390_v19, %v1544_v24 }
 0x791   : > { %v1549_v28 = vmul.f32 %v1548_v27, %v4555_v54  ;;  %v3148_v54 = vld [vmem:[%s4419_s30 + $0x78] sm:$0xff] }
 0x792   : > { %2126 = vmatpush.bf16.msra.mxu2 %v3148_v54 }
 0x793   : > { %v1553_v30 = vmul.f32 %v3374_v26, %v1549_v28 }
 0x795   : > { %v4623_v31 = vadd.f32 %v3375_v29, %v1553_v30 }
 0x796   : > { %2127 = vmatpush.bf16.msra.mxu2 %v3147_v38 }
 0x797   : > { %v1558_v32 = vpack.c.bf16 %v4623_v31, %v4623_v31 }
 0x799   : > { %1769 = vmatmul.bf16.vlgmr.msrb.gmra.mxu1 %v1558_v32  ;;  %1782 = vmatmul.bf16.vlgmr.msrb.gmra.mxu2 %v1558_v32 }
 0x79a   : > { %1795 = vmatmul.bf16.vlgmr.msrb.gmra.mxu3 %v1558_v32  ;;  %1808 = vmatmul.bf16.vlgmr.msra.gmra.mxu0 %v1558_v32 }
 0x79b   : > { %2128 = vmatpush.bf16.msra.mxu2 %v3146_v42 }
 0x79f   : > { %2129 = vmatpush.bf16.msra.mxu2 %v3145_v46 }
 0x7a3   : > { %2130 = vmatpush.bf16.msra.mxu2 %v3144_v49 }
 0x7a7   : > { %2131 = vmatpush.bf16.msra.mxu2 %v3143_v55 }
 0x7ab   : > { %2132 = vmatpush.bf16.msra.mxu2 %v3142_v59 }
 0x7af   : > { %2133 = vmatpush.bf16.msra.mxu2 %v3141_v63 }
 0x816   : > { %v1770_v2 = vpop.f32.mrf.mxu1 }
 0x817   : > { %v1771_v3 = vadd.f32 %v1770_v2, %v1593_v62  ;;  %v1809_v4 = vpop.f32.mrf.mxu0 }
 0x818   : > { %v1810_v5 = vadd.f32 %v1809_v4, %v1596_v1 }
 0x819   : > { %v1813_v6 = vmul.f32 %v1771_v3, %v1771_v3 }
 0x81a   : > { %v1816_v8 = vmul.f32 %v1810_v5, %v1810_v5 }
 0x81b   : > { %v1817_v10 = vmul.f32 %v1813_v6, %v1771_v3 }
 0x81c   : > { %v1820_v11 = vmul.f32 %v1816_v8, %v1810_v5  ;;  %v1783_v12 = vpop.f32.mrf.mxu2 }
 0x81d   : > { %v1821_v13 = vmul.f32 0.044715, %v1817_v10  ;;  %v1784_v14 = vadd.f32 %v1783_v12, %v1594_v7  ;;  %v1796_v15 = vpop.f32.mrf.mxu3 }
 0x81e   : > { %v1824_v16 = vmul.f32 0.044715, %v1820_v11  ;;  %v1797_v17 = vadd.f32 %v1796_v15, %v1595_v9  ;;  %v1772_v18 = vpop.f32.mrf.mxu1 }
 0x81f   : > { %v1825_v19 = vadd.f32 %v1821_v13, %v1771_v3  ;;  %v1814_v20 = vmul.f32 %v1784_v14, %v1784_v14  ;;  %v1811_v21 = vpop.f32.mrf.mxu0 }
 0x820   : > { %v1828_v22 = vadd.f32 %v1824_v16, %v1810_v5  ;;  %v1815_v23 = vmul.f32 %v1797_v17, %v1797_v17 }
 0x821   : > { %v1829_v24 = vmul.f32 0.7978846, %v1825_v19  ;;  %v1818_v26 = vmul.f32 %v1814_v20, %v1784_v14  ;;  %v3377_v20 = vld [vmem:[%s4861_s6] ss:$0 sm:$0xff] }
 0x822   : > { %v1832_v27 = vmul.f32 0.7978846, %v1828_v22  ;;  %v1819_v28 = vmul.f32 %v1815_v23, %v1797_v17  ;;  %v3378_v22 = vld [vmem:[%s1030_s16] ss:$0 sm:$0xff] }
 0x823   : > { %3391 = vtanh.f32 %v1829_v24  ;;  %v1822_v29 = vmul.f32 0.044715, %v1818_v26 }
 0x824   : > { %3393 = vtanh.f32 %v1832_v27  ;;  %v1823_v30 = vmul.f32 0.044715, %v1819_v28  ;;  %v1785_v32 = vpop.f32.mrf.mxu2 }
 0x825   : > { %v1826_v33 = vadd.f32 %v1822_v29, %v1784_v14  ;;  %v1798_v34 = vpop.f32.mrf.mxu3 }
 0x826   : > { %v1827_v54 = vadd.f32 %v1823_v30, %v1797_v17 }
 0x827   : > { %v1830_v35 = vmul.f32 0.7978846, %v1826_v33 }
 0x828   : > { %v1831_v36 = vmul.f32 0.7978846, %v1827_v54 }
 0x829   : > { %v3392_v37 = vpop.eup %3391  ;;  %3395 = vtanh.f32 %v1830_v35 }
 0x82a   : > { %v3394_v38 = vpop.eup %3393  ;;  %3397 = vtanh.f32 %v1831_v36  ;;  %v1837_v39 = vadd.f32 1.0, %v3392_v37 }
 0x82b   : > { %v1840_v40 = vadd.f32 1.0, %v3394_v38 }
 0x82c   : > { %v1841_v41 = vmul.f32 0.5, %v1837_v39 }
 0x82d   : > { %v1844_v42 = vmul.f32 0.5, %v1840_v40 }
 0x82e   : > { %v1845_v43 = vmul.f32 %v1841_v41, %v1771_v3 }
 0x82f   : > { %v3396_v44 = vpop.eup %3395  ;;  %v1848_v45 = vmul.f32 %v1844_v42, %v1810_v5 }
 0x830   : > { %v3398_v46 = vpop.eup %3397  ;;  %v1849_v47 = vpack.c.bf16 %v1845_v43, %v1845_v43  ;;  %v1838_v25 = vadd.f32 1.0, %v3396_v44 }
 0x831   : > { %v1852_v48 = vpack.c.bf16 %v1848_v45, %v1848_v45  ;;  %v1839_v49 = vadd.f32 1.0, %v3398_v46 }
 0x832   : > { %2121 = vmatmul.bf16.vlgmr.msra.gmra.mxu1 %v1849_v47  ;;  %v1842_v50 = vmul.f32 0.5, %v1838_v25 }
 0x833   : > { %2160 = vmatmul.bf16.vlgmr.msrb.gmra.mxu0 %v1852_v48  ;;  %v1843_v52 = vmul.f32 0.5, %v1839_v49 }
 0x834   : > { %v1846_v53 = vmul.f32 %v1842_v50, %v1784_v14 }
 0x835   : > { %v1847_v55 = vmul.f32 %v1843_v52, %v1797_v17 }
 0x836   : > { %v1850_v56 = vpack.c.bf16 %v1846_v53, %v1846_v53 }
 0x837   : > { %v1851_v57 = vpack.c.bf16 %v1847_v55, %v1847_v55 }
 0x838   : > { %2134 = vmatmul.bf16.vlgmr.msra.gmra.mxu2 %v1850_v56 }
 0x839   : > { %2147 = vmatmul.bf16.vlgmr.msra.gmra.mxu3 %v1851_v57 }
 0x8af   : > { %v2122_v58 = vpop.f32.mrf.mxu1 }
 0x8b0   : > { %v2161_v59 = vpop.f32.mrf.mxu0  ;;  %v2123_v63 = vadd.f32 %v3376_v60, %v2122_v58 }
 0x8b7   : > { %v2124_v61 = vpop.f32.mrf.mxu1 }
 0x8b8   : > { %v2163_v62 = vpop.f32.mrf.mxu0 }
 0x8bb   : > { %v2135_v0 = vpop.f32.mrf.mxu2 }
 0x8bc   : > { %v2136_v1 = vadd.f32 %v2135_v0, %v2123_v63  ;;  %v2148_v2 = vpop.f32.mrf.mxu3 }
 0x8be   : > { %v2149_v3 = vadd.f32 %v2148_v2, %v2136_v1 }
 0x8c0   : > { %v2162_v4 = vadd.f32 %v2161_v59, %v2149_v3 }
 0x8c2   : > { %v2165_v5 = vadd.f32 %v2162_v4, %v4623_v31 }
 0x8c3   : > { %v2137_v6 = vpop.f32.mrf.mxu2 }
 0x8c4   : > { %v2150_v7 = vpop.f32.mrf.mxu3  ;;  %2168 = vadd.xlane.f32.xlu2 %v2165_v5 }
 0x937   : > { %v2169_v8 = vpop.xlane.xlu2 %2168 }
 0x938   : > { %v2170_v9 = vmul.f32 %v2169_v8, %v4552_v51 }
 0x93a   : > { %v2171_v10 = vsub.f32 %v2165_v5, %v2170_v9 }
 0x93c   : > { %v2172_v11 = vmul.f32 %v2171_v10, %v2171_v10 }
 0x93e   : > { %2173 = vadd.xlane.f32.xlu2 %v2172_v11 }
 0x9b1   : > { %v2174_v12 = vpop.xlane.xlu2 %2173 }
 0x9b2   : > { %v2175_v13 = vmul.f32 %v2174_v12, %v4552_v51 }
 0x9b4   : > { %v2176_v14 = vadd.f32 1e-12, %v2175_v13 }
 0x9b6   : > { %3399 = vrsqrt.f32 %v2176_v14  ;;  %vm2183_vm11 = vweird.f32 %v2176_v14 }
 0x9bc   : > { %v3400_v15 = vpop.eup %3399 }
 0x9bd   : > { %v2178_v16 = vmul.f32 %v3400_v15, %v2176_v14  ;;  %vm2184_vm10 = vweird.f32 %v3400_v15 }
 0x9be   : > { %vm2185_vm12 = vmor %vm2183_vm11, %vm2184_vm10 }
 0x9bf   : > { %v2179_v17 = vmul.f32 %v3400_v15, %v2178_v16 }
 0x9c1   : > { %v2180_v31 = vmul.f32 0.5, %v2179_v17 }
 0x9c3   : > { %v2181_v18 = vsub.f32 1.5, %v2180_v31 }
 0x9c5   : > { %v2182_v19 = vmul.f32 %v3400_v15, %v2181_v18 }
 0x9c7   : > { %v2186_v21 = vsel %vm2185_vm12, %v3400_v15, %v2182_v19 }
 0x9c8   : > { %v2187_v51 = vmul.f32 %v2186_v21, %v2171_v10  ;;  %2199 = sbr.rel (%p3030_p10) target bundleno = 2511 (0x9cf), region = 152 }
 0x9ca   : > { %v2191_v23 = vmul.f32 %v3377_v20, %v2187_v51 }
 0x9cc   : > { %v2195_v24 = vadd.f32 %v3378_v22, %v2191_v23 }
 0x9ce   : > { %2200 = vst [vmem:[#allocation2] sm:$0xff] %v2195_v24 }
 0x9cf PF: > { %s4864_s13 = sld [smem:[#allocation39_spill]] }
 0x9d5   : > { %p3031_p1 = scmp.ne.s32.totalorder %s4864_s13, 1 }
 0x9d6   : > { %s4865_s20 = sld [smem:[#allocation69_spill]] (!%p3031_p1) }
 0x9d7   : > { %2204 = sbr.rel (%p3031_p1) target bundleno = 2690 (0xa82), region = 156 }
 0x9dc   : > { %v3172_v26 = vld [vmem:[#allocation19 + $0x38] sm:$0xff]  ;;  %v3171_v27 = vld [vmem:[#allocation19 + $0x30] sm:$0xff]  ;;  %v3170_v28 = vld [vmem:[#allocation19 + $0x28] sm:$0xff]  ;;  %v2205_v54 = vpack.c.bf16 %v2195_v24, %v2195_v24 }
 0x9dd   : > { %2271 = vmatpush.bf16.msra.mxu0 %v3172_v26  ;;  %v3169_v29 = vld [vmem:[#allocation19 + $0x20] sm:$0xff]  ;;  %v3168_v30 = vld [vmem:[#allocation19 + $0x18] sm:$0xff]  ;;  %v3167_v32 = vld [vmem:[#allocation19 + $0x10] sm:$0xff] }
 0x9de   : > { %v3166_v33 = vld [vmem:[#allocation19 + $0x8] sm:$0xff]  ;;  %v3165_v34 = vld [vmem:[#allocation19] sm:$0xff]  ;;  %v2222_v35 = vld [vmem:[%s4865_s20] sm:$0x1] }
 0x9e1   : > { %2272 = vmatpush.bf16.msra.mxu0 %v3171_v27 }
 0x9e5   : > { %2273 = vmatpush.bf16.msra.mxu0 %v3170_v28 }
 0x9e9   : > { %2274 = vmatpush.bf16.msra.mxu0 %v3169_v29 }
 0x9ed   : > { %2275 = vmatpush.bf16.msra.mxu0 %v3168_v30 }
 0x9f1   : > { %2276 = vmatpush.bf16.msra.mxu0 %v3167_v32 }
 0x9f5   : > { %2277 = vmatpush.bf16.msra.mxu0 %v3166_v33 }
 0x9f9   : > { %2278 = vmatpush.bf16.msra.mxu0 %v3165_v34 }
 0x9fc   : > { %2279 = vmatmul.bf16.vlgmr.msra.gmra.mxu0 %v2205_v54 }
 0xa79   : > { %v2280_v36 = vpop.f32.mrf.mxu0 }
 0xa7a   : > { %v2281_v37 = vadd.f32 %v2280_v36, %v2222_v35 }
 0xa7c   : > { %2284 = vst [vmem:[%s1017_s22] sm:$0x1] %v2281_v37 }
 0xa81   : > { %v2282_v38 = vpop.f32.mrf.mxu0 }
 0xa82 PF: > { %s4866_s24 = sld [smem:[#allocation40_spill]]  ;;  %s2296_s8 = sshll.u32 %s1017_s22, 4  ;;  %s2297_s8 = int_to_ptr.vmem [resolvable:$true] %s2296_s8 }
 0xa83   : > { %s4867_s1 = sld [smem:[#allocation70_spill]]  ;;  %s2286_s10 = scalar_lea.sflag [#allocation5], %s4336_s17 }
 0xa89   : > { %s4868_s11 = smov %s4867_s1  ;;  %s2294_s5 = scalar_lea.hbm %s4867_s1, %s4866_s24 }
 0xa8a   : > { %s2298_s9 = sshll.u32 %s2294_s5, 4  ;;  %s3811_s26 = scalar_lea.hbm %s4868_s11, 2  ;;  %s2299_s9 = int_to_ptr.hbm [resolvable:$true] %s2298_s9 }
 0xa8b   : > { %s3805_s25 = sshra.s32 %s2299_s9, 4  ;;  %s3806_s25 = int_to_ptr.hbm [resolvable:$true] %s3805_s25 }
 0xa8c   : > { %s3807_s19 = scalar_lea.hbm %s3806_s25, 1  ;;  %p3812_p7 = scmp.lt.s32.totalorder %s3806_s25, %s4868_s11 }
 0xa8d   : > { %p3808_p12 = scmp.ne.s32.totalorder %s3806_s25, %s3807_s19  ;;  %p3813_p9 = scmp.lt.s32.totalorder %s3811_s26, %s3807_s19 }
 0xa8f   : > { %p3809_p4 = pnand %p3808_p12, %p4208_p13  ;;  %p3814_p11 = por %p3813_p9, %p3812_p7 }
 0xa91   : > { %p3810_p5 = pneg %p3809_p4 }
 0xa93   : > { %p3815_p0 = pnand %p3814_p11, %p3810_p5 }
 0xa95   : > { %3818 = shalt.err (!%p3815_p0)
}
 0xa96   : > { %3211 = dma.vmem_to_hbm [thread:$0]  (%p4208_p13), %s2297_s8, 16, %s2299_s9, %s2286_s10  }
 0xa97 PF: > { %s4870_s22 = sld [smem:[#allocation37_spill]]  ;;  %p3265_p2 = scmp.ge.s32.totalorder %s3961_s2, 2 }
 0xa99   : > { %p3255_p6 = pnand %p3265_p2, %p4217_p3 }
 0xa9b   : > { %p3256_p8 = pneg %p3255_p6 }
 0xa9d   : > { %s2310_s6 = sand.u32 1, %s4870_s22  }
 0xa9e   : > { %s2311_s3 = scalar_lea.sflag [#allocation5], %s2310_s6 }
 0xa9f   : > { %3916 = dma.done.wait (%p3256_p8), %s2311_s3, 16  }
 0xaa0   : > { %3918 = vsyncadd (%p3256_p8), %s2311_s3, 4294967280  ;;  %s38_s2 = sadd.s32 1, %s3961_s2   ;;  %s4872_s27 = sld [smem:[#allocation35_spill]] }
 0xaa1   : > { %p35_p10 = scmp.ge.s32.totalorder %s38_s2, 6   ;;  %s4873_s28 = sld [smem:[#allocation36_spill]] }
 0xaa2   : > { %s4874_s29 = sld [smem:[#allocation48_spill]]  ;;  %s4880_s30 = smov %s3937_s0 }
 0xaa3   : > { %s4875_s7 = sld [smem:[#allocation38_spill]]  ;;  %s4882_s1 = smov %s3953_s21 }
 0xaa4   : > { %s4876_s19 = sld [smem:[#allocation49_spill]] }
 0xaa5   : > { %s4877_s20 = sld [smem:[#allocation41_spill]] }
 0xaa6   : > { %s4878_s13 = sld [smem:[#allocation45_spill]] }
 0xaa7   : > { %s4879_s22 = sld [smem:[#allocation47_spill]] }
 0xaa8   :  { %37 = sbr.rel (!%p35_p10) target bundleno = 32 (0x20), region = 274 }
 0xaa9   : > { %s4881_s0 = smov %s4875_s7 }
 0xaac   : > { %s4883_s21 = smov %s4878_s13 }
 0xaad   :  { %2316 = vsyncpa [#allocation4], 1 }
 0xaae   :  { %2318 = vsyncpa [#allocation4 + $0x1], 1 }
 0xaaf   :  { %2319 = vsyncpa [#allocation7], 1 }
 0xab0   :  { %2321 = vsyncpa [#allocation7 + $0x1], 1 }
 0xab1   :  { %2322 = vsyncpa [#allocation10], 1 }
 0xab2   :  { %2323 = vsyncpa [#allocation5], 1 }
 0xab3   :  { %2325 = vsyncpa [#allocation5 + $0x1], 1 }

</bundles_post_ra>
